<compile_context>
chip_gen: v7x
topology: tpu7x:2x2x1
jax: 0.10.0
libtpu: 0.0.40
codegen_flags: <defaults>
</compile_context>

<pallas_src>
import functools
import math

import jax
import jax.numpy as jnp
from jax.experimental import pallas as pl
from jax.experimental.pallas import tpu as pltpu


# ------------------------------- small helpers --------------------------------

def _round_up(x, m):
    return (x + m - 1) // m * m


def _out_hw(h, w, stride):
    # 3x3 conv, padding=1: out = ceil(dim / stride)
    return (h + stride - 1) // stride, (w + stride - 1) // stride


def _const_spec(arr):
    """BlockSpec for a weight that is identical across the batch grid."""
    return pl.BlockSpec(arr.shape, lambda n, _r=arr.ndim: (0,) * _r)


def _vmem_limit(blocks, scratches):
    """Scoped-VMEM limit from the lane/sublane-padded footprint, generation-safe."""
    total = 0
    for rows, cols, nbytes in blocks:          # double-buffered pipeline blocks
        total += 2 * _round_up(rows, 8) * _round_up(cols, 128) * nbytes
    for rows, cols, nbytes in scratches:       # single-buffered scratch
        total += _round_up(rows, 8) * _round_up(cols, 128) * nbytes
    total = 2 * total + (4 << 20)              # headroom
    # >= default (32 MiB), <= 48 MiB so it always fits v7x's 64 MiB per-TC VMEM.
    return max(32 << 20, min(48 << 20, total))


def _compiler_params(vmem_limit_bytes):
    return pltpu.CompilerParams(
        dimension_semantics=("parallel",),
        vmem_limit_bytes=int(vmem_limit_bytes))


# ---------------------------------- kernels ------------------------------------

def _stem_kernel(x_ref, w_ref, sb_ref, o_ref, xz_ref, *, Ho, Wo):
    """Fused stem on the 2x2 space-to-depth input.

    A stride-1 2x2 conv with 12 input channels per tap, equivalent to
    Conv2d(3, 32, 3, stride=2, padding=1, bias=False) + BN + ReLU6.
    """
    Mo = Ho * Wo
    START = _round_up(Wo + 1, 8)

    x2d = x_ref[0]                                        # (Mo, 12) bf16

    # zero ONLY the top pad rows (the bottom pad is never read); every grid step
    xz_ref[0:START, :] = jnp.zeros((START, xz_ref.shape[1]), xz_ref.dtype)
    xz_ref[START:START + Mo, :] = x2d.astype(xz_ref.dtype)

    # in-kernel left-border mask (replaces the old HBM mask input)
    col = jax.lax.broadcasted_iota(jnp.int32, (Mo, 1), 0) % Wo
    mask_l = (col > 0).astype(jnp.float32)

    acc = None
    for a in range(2):
        for b in range(2):
            if a == 1 and b == 1:
                tap_b = x2d                               # reuse the live value
            else:
                base = START + (a - 1) * Wo + (b - 1)
                tap = xz_ref[base:base + Mo, :]
                if b == 0:
                    tap = tap * mask_l
                tap_b = tap.astype(jnp.bfloat16)
            term = jnp.dot(tap_b, w_ref[a * 2 + b],
                           preferred_element_type=jnp.float32)
            acc = term if acc is None else acc + term

    z = jnp.clip(acc * sb_ref[0:1, :] + sb_ref[1:2, :], 0.0, 6.0)
    o_ref[...] = z.astype(o_ref.dtype).reshape(o_ref.shape)


def _ir_chain_kernel(*refs, H, W, cfgs):
    """Chain of fused inverted-residual layers sharing the same input resolution.

    Each layer: expand 1x1 (optional) -> depthwise 3x3 (stride 1 or 2, pad 1) + BN
    + ReLU6 -> project 1x1 + BN [+ residual].  Only the LAST layer may have stride 2
    (it is evaluated directly at its output positions, no subsample pass).
    cfgs: tuple of (stride, cout, hidden, has_expand, has_res).
    """
    it = iter(refs)
    x_ref = next(it)
    lrefs = []
    for (stride, cout, hidden, has_expand, has_res) in cfgs:
        names = (('exp_w', 'exp_sb') if has_expand else ()) + \
                ('dw_w', 'dw_sb', 'pw_w', 'pw_sb')
        lrefs.append({name: next(it) for name in names})
    o_ref = next(it)
    hz_ref = next(it)
    dacc_ref = next(it) if cfgs[-1][0] == 2 else None

    M = H * W
    START = _round_up(W + 1, 8)
    rows = hz_ref.shape[0]
    width = hz_ref.shape[1]

    # zero ONLY the pad rows (interior is fully overwritten each layer).  Done every
    # grid step so it stays correct under megacore grid splitting.
    hz_ref[0:START, :] = jnp.zeros((START, width), hz_ref.dtype)
    hz_ref[START + M:rows, :] = jnp.zeros((rows - START - M, width), hz_ref.dtype)

    # in-kernel column masks for the horizontal 3x3 borders (hoisted above taps)
    if any(s == 1 for (s, *_r) in cfgs):
        col = jax.lax.broadcasted_iota(jnp.int32, (M, 1), 0) % W
        mask_l = (col > 0).astype(jnp.float32)
        mask_r = (col < (W - 1)).astype(jnp.float32)

    cur = x_ref[0]                                        # (M, Cin0) bf16
    for li, (stride, cout, hidden, has_expand, has_res) in enumerate(cfgs):
        r = lrefs[li]

        # --- expand: 1x1 conv + BN + ReLU6 (bf16 MXU operands, f32 accumulate) ----
        if has_expand:
            h = jnp.dot(cur.astype(jnp.bfloat16), r['exp_w'][...],
                        preferred_element_type=jnp.float32)
            h = jnp.clip(h * r['exp_sb'][0:1, :] + r['exp_sb'][1:2, :], 0.0, 6.0)
        else:
            h = cur.astype(jnp.float32)

        # --- depthwise 3x3 + BN + ReLU6 on the zero-padded VMEM scratch -----------
        hz_ref[START:START + M, 0:hidden] = h
        dw_w, dw_sb = r['dw_w'], r['dw_sb']

        if stride == 1:
            acc = None
            for kh in range(3):
                for kw in range(3):
                    k = kh * 3 + kw
                    if kh == 1 and kw == 1:
                        tap = h                            # reuse the live value
                    else:
                        base = START + (kh - 1) * W + (kw - 1)
                        tap = hz_ref[base:base + M, 0:hidden]
                    term = tap * dw_w[k:k + 1, :]
                    if kw == 0:
                        term = term * mask_l
                    elif kw == 2:
                        term = term * mask_r
                    acc = term if acc is None else acc + term
            d = jnp.clip(acc * dw_sb[0:1, :] + dw_sb[1:2, :], 0.0, 6.0)
        else:
            # direct stride-2 taps: evaluate only at the Mo output positions
            Ho, Wo = _out_hw(H, W, 2)
            colo = jax.lax.broadcasted_iota(jnp.int32, (Wo, 1), 0)
            m2_l = (colo > 0).astype(jnp.float32)
            m2_r = ((2 * colo + 1) < W).astype(jnp.float32)
            # TODO(synk): switch to lax.fori_loop over output rows for large Ho.
            for io in range(Ho):
                acc = None
                for kh in range(3):
                    for kw in range(3):
                        base = START + (2 * io + kh - 1) * W + (kw - 1)
                        if Wo > 1:
                            tap = hz_ref[pl.ds(base, Wo, stride=2), 0:hidden]
                        else:
                            tap = hz_ref[pl.ds(base, 1), 0:hidden]
                        term = tap * dw_w[kh * 3 + kw:kh * 3 + kw + 1, :]
                        if kw == 0:
                            term = term * m2_l
                        elif kw == 2 and (W % 2 == 1):
                            term = term * m2_r
                        acc = term if acc is None else acc + term
                drow = jnp.clip(acc * dw_sb[0:1, :] + dw_sb[1:2, :], 0.0, 6.0)
                dacc_ref[io * Wo:(io + 1) * Wo, :] = drow
            d = dacc_ref[...]

        # --- project: 1x1 conv + BN (linear) [+ fused residual] -------------------
        z = jnp.dot(d.astype(jnp.bfloat16), r['pw_w'][...],
                    preferred_element_type=jnp.float32)
        z = z * r['pw_sb'][0:1, :] + r['pw_sb'][1:2, :]
        if has_res:
            z = z + cur
        cur = z

    o_ref[...] = cur.astype(o_ref.dtype).reshape(o_ref.shape)


# ------------------------------- kernel wrappers -------------------------------

def stem_forward(x_nhwc, p):
    N, H, W, cin = x_nhwc.shape
    assert cin == 3 and H % 2 == 0 and W % 2 == 0
    Ho, Wo = H // 2, W // 2
    Mo = Ho * Wo
    cout = p['sb'].shape[1]
    START = _round_up(Wo + 1, 8)

    # 2x2 space-to-depth in XLA: (N,H,W,3) -> (N, Ho*Wo, 12), channel = (dy, dx, c)
    xs = (x_nhwc.reshape(N, Ho, 2, Wo, 2, 3)
                .transpose((0, 1, 3, 2, 4, 5))
                .reshape(N, Mo, 12)
                .astype(jnp.bfloat16))

    kernel = functools.partial(_stem_kernel, Ho=Ho, Wo=Wo)
    limit = _vmem_limit(
        blocks=[(Mo, 12, 2), (Mo, cout, 2), (48, cout, 2), (2, cout, 4)],
        scratches=[(START + Mo, 12, 4)])
    out = pl.pallas_call(
        kernel,
        out_shape=jax.ShapeDtypeStruct((N, Mo, cout), jnp.bfloat16),
        grid=(N,),
        in_specs=[pl.BlockSpec((1, Mo, 12), lambda n: (n, 0, 0)),
                  _const_spec(p['w4']), _const_spec(p['sb'])],
        out_specs=pl.BlockSpec((1, Mo, cout), lambda n: (n, 0, 0)),
        scratch_shapes=[pltpu.VMEM((START + Mo, 12), jnp.float32)],
        compiler_params=_compiler_params(limit),
    )(xs, p['w4'], p['sb'])
    return out.reshape(N, Ho, Wo, cout)


def ir_chain_forward(x_nhwc, plist):
    """One fused kernel for a run of inverted-residual layers (stride-2 only last)."""
    assert len(plist) >= 1
    N, H, W, cin0 = x_nhwc.shape
    M = H * W
    START = _round_up(W + 1, 8)

    cfgs, weights = [], []
    for p in plist:
        has_expand = 'exp_w' in p
        has_res = (p['stride'] == 1 and p['cin'] == p['cout'])
        cfgs.append((p['stride'], p['cout'], p['hidden'], has_expand, has_res))
        if has_expand:
            weights += [p['exp_w'], p['exp_sb']]
        weights += [p['dw_w'], p['dw_sb'], p['pw_w'], p['pw_sb']]
    assert all(s == 1 for (s, *_r) in cfgs[:-1]), "stride-2 only as chain tail"

    stride_last, cout_last, hidden_last = cfgs[-1][0], cfgs[-1][1], cfgs[-1][2]
    Ho, Wo = _out_hw(H, W, stride_last)
    Mo = Ho * Wo
    hz_rows = START + M + W + 1
    hz_width = max(c[2] for c in cfgs)

    scratch = [pltpu.VMEM((hz_rows, hz_width), jnp.float32)]
    scratch_est = [(hz_rows, hz_width, 4)]
    if stride_last == 2:
        scratch.append(pltpu.VMEM((Mo, hidden_last), jnp.float32))
        scratch_est.append((Mo, hidden_last, 4))

    x2 = x_nhwc.reshape(N, M, cin0).astype(jnp.bfloat16)
    kernel = functools.partial(_ir_chain_kernel, H=H, W=W, cfgs=tuple(cfgs))
    limit = _vmem_limit(
        blocks=[(M, cin0, 2), (Mo, cout_last, 2)]
               + [(w.shape[0], w.shape[-1], w.dtype.itemsize) for w in weights],
        scratches=scratch_est)
    out = pl.pallas_call(
        kernel,
        out_shape=jax.ShapeDtypeStruct((N, Mo, cout_last), jnp.bfloat16),
        grid=(N,),
        in_specs=[pl.BlockSpec((1, M, cin0), lambda n: (n, 0, 0))]
                 + [_const_spec(w) for w in weights],
        out_specs=pl.BlockSpec((1, Mo, cout_last), lambda n: (n, 0, 0)),
        scratch_shapes=scratch,
        compiler_params=_compiler_params(limit),
    )(x2, *weights)
    return out.reshape(N, Ho, Wo, cout_last)


# ---------------------------- MobileNetV2 structure ----------------------------

# (cin, cout, stride, expand_ratio) for mobilenet_v2.features[1..14]
IR_CONFIGS = [
    (32, 16, 1, 1), (16, 24, 2, 6), (24, 24, 1, 6), (24, 32, 2, 6),
    (32, 32, 1, 6), (32, 32, 1, 6), (32, 64, 2, 6), (64, 64, 1, 6),
    (64, 64, 1, 6), (64, 64, 1, 6), (64, 96, 1, 6), (96, 96, 1, 6),
    (96, 96, 1, 6), (96, 160, 2, 6),
]
# btnecks: features[0:3], [3:5], [5:8], [8:15]
BLOCK_LAYERS = [[0, 1, 2], [3, 4], [5, 6, 7], [8, 9, 10, 11, 12, 13, 14]]

IMAGENET_MEAN = jnp.array([0.485, 0.456, 0.406], jnp.float32)
IMAGENET_STD = jnp.array([0.229, 0.224, 0.225], jnp.float32)


def _chains_for_block(block):
    """Fusion plan: maximal runs of stride-1 layers, each optionally closed by the
    following stride-2 layer."""
    chains, cur = [], []
    for idx in BLOCK_LAYERS[block]:
        if idx == 0:
            chains.append(('stem', [0]))
        elif IR_CONFIGS[idx - 1][2] == 1:
            cur.append(idx)
        else:                               # stride-2 layer closes the chain
            cur.append(idx)
            chains.append(('ir', cur))
            cur = []
    if cur:
        chains.append(('ir', cur))
    return chains


def _bn_sb(key, c):
    """Eval-mode BatchNorm folded to a (2, c) [scale; bias] array (deterministic)."""
    k1, k2, k3, k4 = jax.random.split(key, 4)
    gamma = 1.0 + 0.1 * jax.random.normal(k1, (c,), jnp.float32)
    beta = 0.1 * jax.random.normal(k2, (c,), jnp.float32)
    mean = 0.1 * jax.random.normal(k3, (c,), jnp.float32)
    var = 1.0 + 0.1 * jax.random.uniform(k4, (c,), jnp.float32)
    scale = gamma / jnp.sqrt(var + 1e-5)
    bias = beta - mean * scale
    return jnp.stack([scale, bias], axis=0)


def _stem_s2d_weight(w9):
    """Rearrange a (9, 3, cout) 3x3/s2 conv weight (tap k = kh*3+kw) into the
    (4, 12, cout) 2x2 space-to-depth form (tap t = a*2+b, channel = dy*6+dx*3+c)."""
    cout = w9.shape[-1]
    w4 = []
    for a in range(2):
        for b in range(2):
            taps = []
            for dy in range(2):
                for dx in range(2):
                    kh = 2 * a + dy - 1
                    kw = 2 * b + dx - 1
                    if 0 <= kh < 3 and 0 <= kw < 3:
                        taps.append(w9[kh * 3 + kw])
                    else:
                        taps.append(jnp.zeros((3, cout), w9.dtype))
            w4.append(jnp.concatenate(taps, axis=0))       # (12, cout)
    return jnp.stack(w4, axis=0)                            # (4, 12, cout)


def init_params(key):
    keys = jax.random.split(key, 64)
    params = {}
    # features[0]: Conv2d(3, 32, 3, stride=2, padding=1, bias=False) + BN + ReLU6
    # TODO(synk): if real torchvision weights are loaded, the (9,3,32) tap order
    # must be kh*3+kw and channel order (cin, cout) before _stem_s2d_weight.
    w9 = jax.random.normal(keys[0], (9, 3, 32), jnp.float32) / math.sqrt(27.0)
    params[0] = {'type': 'stem', 'stride': 2,
                 'w4': _stem_s2d_weight(w9).astype(jnp.bfloat16),
                 'sb': _bn_sb(keys[1], 32)}
    # features[1..14]: inverted residuals
    for i, (cin, cout, stride, t) in enumerate(IR_CONFIGS, start=1):
        k = jax.random.split(keys[i + 1], 6)
        hidden = cin * t
        p = {'type': 'ir', 'stride': stride, 'cin': cin, 'cout': cout,
             'hidden': hidden}
        if t != 1:
            p['exp_w'] = (jax.random.normal(k[0], (cin, hidden), jnp.float32)
                          / math.sqrt(cin)).astype(jnp.bfloat16)
            p['exp_sb'] = _bn_sb(k[1], hidden)
        p['dw_w'] = 0.3 * jax.random.normal(k[2], (9, hidden), jnp.float32)
        p['dw_sb'] = _bn_sb(k[3], hidden)
        p['pw_w'] = (jax.random.normal(k[4], (hidden, cout), jnp.float32)
                     / math.sqrt(hidden)).astype(jnp.bfloat16)
        p['pw_sb'] = _bn_sb(k[5], cout)
        params[i] = p
    return params


def run_block(block, x_nhwc, params):
    h = x_nhwc
    for kind, idxs in _chains_for_block(block):
        if kind == 'stem':
            h = stem_forward(h, params[0])
        else:
            h = ir_chain_forward(h, [params[i] for i in idxs])
    return h


def mobilenet_encoder_forward(block, x_nchw, params):
    """Matches MobilenetEncoder.forward(block, input): normalize, then btnecks[block]."""
    assert x_nchw.shape[1] == 3, "transforms.Normalize uses 3-channel ImageNet stats"
    x = (x_nchw - IMAGENET_MEAN.reshape(1, 3, 1, 1)) / IMAGENET_STD.reshape(1, 3, 1, 1)
    x = jnp.transpose(x, (0, 2, 3, 1))          # NCHW -> NHWC for the kernels
    y = run_block(block, x, params)
    return jnp.transpose(y, (0, 3, 1, 2)).astype(jnp.float32)   # back to NCHW


# ------------------------------------ main --------------------------------------

if __name__ == "__main__":
    key = jax.random.PRNGKey(0)
    kx, kp = jax.random.split(key)
    params = init_params(kp)

    # small image-like input, NCHW, values in [0, 1]
    x = jax.random.uniform(kx, (2, 3, 32, 32), dtype=jnp.float32)

    # block 0 through the full forward (preprocess + features[0:3])
    out0 = mobilenet_encoder_forward(0, x, params)
    jax.block_until_ready(out0)
    assert out0.shape == (2, 24, 8, 8), out0.shape

    # exercise the remaining bottleneck groups on the chained intermediate features
    # (their preprocess requires 3-channel input, exactly as in PyTorch, so the
    # feature blocks are called directly here to validate every fused kernel).
    h = jnp.transpose(out0, (0, 2, 3, 1))  # NHWC
    expected = {1: (2, 4, 4, 32), 2: (2, 2, 2, 64), 3: (2, 1, 1, 160)}
    for blk in (1, 2, 3):
        h = run_block(blk, h, params)
        jax.block_until_ready(h)
        assert h.shape == expected[blk], (blk, h.shape)

    print("KERNEL_OK")
</pallas_src>

<mosaic_0001>
module attributes {stable_mosaic.version = 11 : i64} {
  func.func @_stem_kernel(%arg0: i32, %arg1: memref<1x256x12xbf16, #tpu.memory_space<vmem>>, %arg2: memref<4x12x32xbf16, #tpu.memory_space<vmem>>, %arg3: memref<2x32xf32, #tpu.memory_space<vmem>>, %arg4: memref<1x256x32xbf16, #tpu.memory_space<vmem>>, %arg5: memref<280x12xf32, #tpu.memory_space<vmem>>) attributes {dimension_semantics = [#tpu.dimension_semantics<parallel>], iteration_bounds = array<i64: 2>, scalar_prefetch = 0 : i64, scratch_operands = 1 : i64, tpu.core_type = #tpu.core_type<tc>, window_params = [{transform_indices = @transform_0, window_bounds = array<i64: 1, 256, 12>}, {pipeline_mode = #tpu.pipeline_mode<synchronous>, transform_indices = @transform_1, window_bounds = array<i64: 4, 12, 32>}, {pipeline_mode = #tpu.pipeline_mode<synchronous>, transform_indices = @transform_2, window_bounds = array<i64: 2, 32>}, {transform_indices = @transform_3, window_bounds = array<i64: 1, 256, 32>}]} {
    %c0 = arith.constant 0 : index
    %c0_0 = arith.constant 0 : index
    %c0_1 = arith.constant 0 : index
    %0 = vector.load %arg1[%c0, %c0_0, %c0_1] : memref<1x256x12xbf16, #tpu.memory_space<vmem>>, vector<1x256x12xbf16>
    %1 = vector.shape_cast %0 : vector<1x256x12xbf16> to vector<256x12xbf16>
    %cst = arith.constant 0.000000e+00 : f32
    %2 = vector.broadcast %cst : f32 to vector<24x12xf32>
    %c0_2 = arith.constant 0 : index
    %c0_3 = arith.constant 0 : index
    %3 = vector.load %arg5[%c0_2, %c0_3] : memref<280x12xf32, #tpu.memory_space<vmem>>, vector<24x12xf32>
    tpu.vector_store %arg5[%c0_2, %c0_3], %2 {strides = array<i32>} : memref<280x12xf32, #tpu.memory_space<vmem>>, vector<24x12xf32>,
    %4 = arith.extf %1 : vector<256x12xbf16> to vector<256x12xf32>
    %c24 = arith.constant 24 : index
    %c0_4 = arith.constant 0 : index
    %5 = vector.load %arg5[%c24, %c0_4] : memref<280x12xf32, #tpu.memory_space<vmem>>, vector<256x12xf32>
    tpu.vector_store %arg5[%c24, %c0_4], %4 {strides = array<i32>} : memref<280x12xf32, #tpu.memory_space<vmem>>, vector<256x12xf32>,
    %6 = tpu.iota {dimensions = array<i32: 0>} : vector<256x1xi32>
    %c16_i32 = arith.constant 16 : i32
    %c0_i32 = arith.constant 0 : i32
    %7 = arith.cmpi eq, %c16_i32, %c0_i32 : i32
    %c1_i32 = arith.constant 1 : i32
    %8 = arith.select %7, %c1_i32, %c16_i32 : i32
    %9 = vector.broadcast %8 : i32 to vector<256x1xi32>
    %10 = arith.remsi %6, %9 : vector<256x1xi32>
    %c0_i32_5 = arith.constant 0 : i32
    %11 = vector.broadcast %c0_i32_5 : i32 to vector<256x1xi32>
    %12 = arith.cmpi ne, %10, %11 : vector<256x1xi32>
    %c0_i32_6 = arith.constant 0 : i32
    %13 = vector.broadcast %c0_i32_6 : i32 to vector<256x1xi32>
    %14 = arith.cmpi slt, %10, %13 : vector<256x1xi32>
    %c0_i32_7 = arith.constant 0 : i32
    %15 = arith.cmpi slt, %8, %c0_i32_7 : i32
    %16 = vector.broadcast %15 : i1 to vector<256x1xi1>
    %17 = vector.broadcast %16 : vector<256x1xi1> to vector<256x1xi1>
    %18 = arith.xori %14, %17 : vector<256x1xi1>
    %19 = arith.andi %18, %12 : vector<256x1xi1>
    %20 = vector.broadcast %8 : i32 to vector<256x1xi32>
    %21 = arith.addi %10, %20 : vector<256x1xi32>
    %22 = arith.select %19, %21, %10 : vector<256x1xi1>, vector<256x1xi32>
    %c0_i32_8 = arith.constant 0 : i32
    %23 = vector.broadcast %c0_i32_8 : i32 to vector<256x1xi32>
    %24 = arith.cmpi sgt, %22, %23 : vector<256x1xi32>
    %25 = arith.extui %24 : vector<256x1xi1> to vector<256x1xi32>
    %26 = arith.sitofp %25 : vector<256x1xi32> to vector<256x1xf32>
    %c7 = arith.constant 7 : index
    %c0_9 = arith.constant 0 : index
    %27 = vector.load %arg5[%c7, %c0_9] : memref<280x12xf32, #tpu.memory_space<vmem>>, vector<256x12xf32>
    %28 = vector.broadcast %26 : vector<256x1xf32> to vector<256x12xf32>
    %29 = arith.mulf %27, %28 : vector<256x12xf32>
    %30 = arith.truncf %29 : vector<256x12xf32> to vector<256x12xbf16>
    %c0_10 = arith.constant 0 : index
    %c0_11 = arith.constant 0 : index
    %c0_12 = arith.constant 0 : index
    %31 = vector.load %arg2[%c0_10, %c0_11, %c0_12] : memref<4x12x32xbf16, #tpu.memory_space<vmem>>, vector<1x12x32xbf16>
    %32 = vector.shape_cast %31 : vector<1x12x32xbf16> to vector<12x32xbf16>
    %cst_13 = arith.constant dense<0.000000e+00> : vector<256x32xf32>
    %33 = tpu.matmul %30, %32, %cst_13 {dimension_numbers = #tpu.dot_dimension_numbers<[1], [0], [0], [1], [0, 0, 1, 1], [], []>} : vector<256x12xbf16>, vector<12x32xbf16>, vector<256x32xf32> -> vector<256x32xf32>
    %c8 = arith.constant 8 : index
    %c0_14 = arith.constant 0 : index
    %34 = vector.load %arg5[%c8, %c0_14] : memref<280x12xf32, #tpu.memory_space<vmem>>, vector<256x12xf32>
    %35 = arith.truncf %34 : vector<256x12xf32> to vector<256x12xbf16>
    %c1 = arith.constant 1 : index
    %c0_15 = arith.constant 0 : index
    %c0_16 = arith.constant 0 : index
    %36 = vector.load %arg2[%c1, %c0_15, %c0_16] : memref<4x12x32xbf16, #tpu.memory_space<vmem>>, vector<1x12x32xbf16>
    %37 = vector.shape_cast %36 : vector<1x12x32xbf16> to vector<12x32xbf16>
    %cst_17 = arith.constant dense<0.000000e+00> : vector<256x32xf32>
    %38 = tpu.matmul %35, %37, %cst_17 {dimension_numbers = #tpu.dot_dimension_numbers<[1], [0], [0], [1], [0, 0, 1, 1], [], []>} : vector<256x12xbf16>, vector<12x32xbf16>, vector<256x32xf32> -> vector<256x32xf32>
    %39 = arith.addf %33, %38 : vector<256x32xf32>
    %c23 = arith.constant 23 : index
    %c0_18 = arith.constant 0 : index
    %40 = vector.load %arg5[%c23, %c0_18] : memref<280x12xf32, #tpu.memory_space<vmem>>, vector<256x12xf32>
    %41 = vector.broadcast %26 : vector<256x1xf32> to vector<256x12xf32>
    %42 = arith.mulf %40, %41 : vector<256x12xf32>
    %43 = arith.truncf %42 : vector<256x12xf32> to vector<256x12xbf16>
    %c2 = arith.constant 2 : index
    %c0_19 = arith.constant 0 : index
    %c0_20 = arith.constant 0 : index
    %44 = vector.load %arg2[%c2, %c0_19, %c0_20] : memref<4x12x32xbf16, #tpu.memory_space<vmem>>, vector<1x12x32xbf16>
    %45 = vector.shape_cast %44 : vector<1x12x32xbf16> to vector<12x32xbf16>
    %cst_21 = arith.constant dense<0.000000e+00> : vector<256x32xf32>
    %46 = tpu.matmul %43, %45, %cst_21 {dimension_numbers = #tpu.dot_dimension_numbers<[1], [0], [0], [1], [0, 0, 1, 1], [], []>} : vector<256x12xbf16>, vector<12x32xbf16>, vector<256x32xf32> -> vector<256x32xf32>
    %47 = arith.addf %39, %46 : vector<256x32xf32>
    %c3 = arith.constant 3 : index
    %c0_22 = arith.constant 0 : index
    %c0_23 = arith.constant 0 : index
    %48 = vector.load %arg2[%c3, %c0_22, %c0_23] : memref<4x12x32xbf16, #tpu.memory_space<vmem>>, vector<1x12x32xbf16>
    %49 = vector.shape_cast %48 : vector<1x12x32xbf16> to vector<12x32xbf16>
    %cst_24 = arith.constant dense<0.000000e+00> : vector<256x32xf32>
    %50 = tpu.matmul %1, %49, %cst_24 {dimension_numbers = #tpu.dot_dimension_numbers<[1], [0], [0], [1], [0, 0, 1, 1], [], []>} : vector<256x12xbf16>, vector<12x32xbf16>, vector<256x32xf32> -> vector<256x32xf32>
    %51 = arith.addf %47, %50 : vector<256x32xf32>
    %c0_25 = arith.constant 0 : index
    %c0_26 = arith.constant 0 : index
    %52 = vector.load %arg3[%c0_25, %c0_26] : memref<2x32xf32, #tpu.memory_space<vmem>>, vector<1x32xf32>
    %53 = vector.broadcast %52 : vector<1x32xf32> to vector<256x32xf32>
    %54 = arith.mulf %51, %53 : vector<256x32xf32>
    %c1_27 = arith.constant 1 : index
    %c0_28 = arith.constant 0 : index
    %55 = vector.load %arg3[%c1_27, %c0_28] : memref<2x32xf32, #tpu.memory_space<vmem>>, vector<1x32xf32>
    %56 = vector.broadcast %55 : vector<1x32xf32> to vector<256x32xf32>
    %57 = arith.addf %54, %56 : vector<256x32xf32>
    %cst_29 = arith.constant 0.000000e+00 : f32
    %cst_30 = arith.constant 6.000000e+00 : f32
    %58 = vector.broadcast %cst_29 : f32 to vector<256x32xf32>
    %59 = arith.maximumf %58, %57 : vector<256x32xf32>
    %60 = vector.broadcast %cst_30 : f32 to vector<256x32xf32>
    %61 = arith.minimumf %60, %59 : vector<256x32xf32>
    %62 = arith.truncf %61 : vector<256x32xf32> to vector<256x32xbf16>
    %63 = vector.shape_cast %62 : vector<256x32xbf16> to vector<1x256x32xbf16>
    %c0_31 = arith.constant 0 : index
    %c0_32 = arith.constant 0 : index
    %c0_33 = arith.constant 0 : index
    %64 = vector.load %arg4[%c0_31, %c0_32, %c0_33] : memref<1x256x32xbf16, #tpu.memory_space<vmem>>, vector<1x256x32xbf16>
    tpu.vector_store %arg4[%c0_31, %c0_32, %c0_33], %63 {strides = array<i32>} : memref<1x256x32xbf16, #tpu.memory_space<vmem>>, vector<1x256x32xbf16>,
    return
  }
  func.func @transform_0(%arg0: i32) -> (i32, i32, i32) {
    %c0_i32 = arith.constant 0 : i32
    %c0_i32_0 = arith.constant 0 : i32
    %c0_i32_1 = arith.constant 0 : i32
    return %arg0, %c0_i32, %c0_i32_0 : i32, i32, i32
  }
  func.func @transform_1(%arg0: i32) -> (i32, i32, i32) {
    %c0_i32 = arith.constant 0 : i32
    %c0_i32_0 = arith.constant 0 : i32
    %c0_i32_1 = arith.constant 0 : i32
    %c0_i32_2 = arith.constant 0 : i32
    return %c0_i32, %c0_i32_0, %c0_i32_1 : i32, i32, i32
  }
  func.func @transform_2(%arg0: i32) -> (i32, i32) {
    %c0_i32 = arith.constant 0 : i32
    %c0_i32_0 = arith.constant 0 : i32
    %c0_i32_1 = arith.constant 0 : i32
    return %c0_i32, %c0_i32_0 : i32, i32
  }
  func.func @transform_3(%arg0: i32) -> (i32, i32, i32) {
    %c0_i32 = arith.constant 0 : i32
    %c0_i32_0 = arith.constant 0 : i32
    %c0_i32_1 = arith.constant 0 : i32
    return %arg0, %c0_i32, %c0_i32_0 : i32, i32, i32
  }
}

</mosaic_0001>

<bundles_post_ra>
// kernel: tpu_custom_call.1
= control target key start
LH: loop header
LB: loop body
LE: loop exit
PB: predicated region body
PF: predicated region fallthrough
CT: control target
= control target key end

     0   :  { %s2918_s12 = smov 0   ;;  %s3582_s0 = inlined_call_operand.vmem [shape: bf16[2,256,12], index: 0, kind: input, shape index: {}]   ;;  %s3583_s1 = inlined_call_operand.vmem [shape: bf16[4,12,32], index: 1, kind: input, shape index: {}]   ;;  %s3584_s2 = inlined_call_operand.vmem [shape: f32[2,32], index: 2, kind: input, shape index: {}]   ;;  %s3585_s3 = inlined_call_operand.vmem [shape: bf16[2,256,32], index: 3, kind: output, shape index: {}]  }
   0x1 LB: > { %s2371_s13 = sadd.s32 4294967295, %s2895_s12   ;;  %p2375_p0 = scmp.ge.s32.totalorder %s2895_s12, 1  ;;  %s2895_s12 = sphi %s2918_s12, %s13_s12  }
   0x2   : > { %p137_p1 = scmp.lt.s32.totalorder %s2895_s12, 3 }
   0x4   : > { %p138_p2 = pnand %p2375_p0, %p137_p1 }
   0x6   : > { %141 = sbr.rel (%p138_p2) target bundleno = 384 (0x180), region = 32 }
   0xd   : > { %v2869_v0 = vld [vmem:[%s3583_s1 + $0x8] sm:$0x3f]   ;;  %v272_v1 = vlaneseq  ;;  %vm971_vm0 = vcmask 1045504   ;;  %vm204_vm1 = vcmask 97280   ;;  %v2870_v3 = vld [vmem:[%s3583_s1 + $0x10] sm:$0x3f]  }
   0xe   : > { %2856 = vmatprep.subr.msk.bf16.mxu1 %vm971_vm0, %v2869_v0  ;;  %v973_v2 = vsel %vm971_vm0, %v2869_v0, 0  ;;  %p161_p3 = scmp.lt.s32.totalorder %s2371_s13, 1  ;;  %v3586_v5 = vmov 0.0   ;;  %v2945_v6 = vld [vmem:[%s3583_s1] sm:$0x3f]   ;;  %2858 = vmatprep.subr.msk.bf16.mxu0 %vm971_vm0, %v2870_v3  ;;  %v1490_v7 = vsel %vm971_vm0, %v2870_v3, 0 }
   0xf   : > { %v2934_v4 = vshrl.u32 %v272_v1, 7  ;;  %2625 = vmatpush3.bf16.msra.mxu1 %v973_v2  ;;  %206 = vst.msk [vmem:[#allocation2 + $0x8] sm:$0xff] %vm204_vm1, %v3586_v5  ;;  %207 = vst.msk [vmem:[#allocation2 + $0x10] sm:$0xff] %vm204_vm1, %v3586_v5  ;;  %2693 = vmatpush3.bf16.msra.mxu0 %v1490_v7  ;;  %v2956_v8 = vld [vmem:[%s3583_s1 + $0x18] sm:$0x3f]   ;;  %v1190_v54 = vsel %vm971_vm0, %v2945_v6, 0 }
  0x10   : > { %205 = vst.msk [vmem:[#allocation2] sm:$0xff] %vm204_vm1, %v3586_v5  ;;  %s3637_s13 = smov (!%p161_p3, %s2371_s13), 1  ;;  %2857 = vmatprep.subr.msk.bf16.mxu1 %vm971_vm0, %v2945_v6  ;;  %2859 = vmatprep.subr.msk.bf16.mxu0 %vm971_vm0, %v2956_v8 }
  0x11   : > { %s2522_s22 = sshll.u32 %s3637_s13, 7  ;;  %v275_v9 = vadd.s32 16, %v2934_v4  ;;  %v277_v10 = vadd.s32 32, %v2934_v4  ;;  %v309_v12 = vand.u32 15, %v2934_v4  ;;  %v279_v26 = vadd.s32 48, %v2934_v4 }
  0x12   : > { %s2965_s25 = scalar_lea.vmem %s3582_s0, %s2522_s22  ;;  %v281_v31 = vadd.s32 64, %v2934_v4  ;;  %v283_v56 = vadd.s32 80, %v2934_v4  ;;  %s3457_s5 = scalar_lea.vmem %s3585_s3, %s2522_s22 }
  0x13   : > { %v2971_v11 = vld [vmem:[%s2965_s25] sm:$0xff]   ;;  %v2975_v13 = vld [vmem:[%s2965_s25 + $0x8] sm:$0xff]   ;;  %v2978_v14 = vld [vmem:[%s2965_s25 + $0x10] sm:$0xff]   ;;  %v323_v23 = vand.u32 15, %v275_v9  ;;  %v337_v29 = vand.u32 15, %v277_v10  ;;  %vm3014_vm2 = vcmp.gt.s32.totalorder %v309_v12, 0 }
  0x14   : > { %v208_v15 = vunpack.c.l.bf16 %v2971_v11  ;;  %v209_v16 = vunpack.c.h.bf16 %v2971_v11  ;;  %v210_v17 = vunpack.c.l.bf16 %v2975_v13  ;;  %v211_v18 = vunpack.c.h.bf16 %v2975_v13  ;;  %v2985_v19 = vld [vmem:[%s2965_s25 + $0x18] sm:$0xff]   ;;  %v2988_v20 = vld [vmem:[%s2965_s25 + $0x20] sm:$0xff]   ;;  %v2994_v27 = vld [vmem:[%s2965_s25 + $0x28] sm:$0xff]  }
  0x15   : > { %v212_v24 = vunpack.c.l.bf16 %v2978_v14  ;;  %v213_v25 = vunpack.c.h.bf16 %v2978_v14  ;;  %v214_v30 = vunpack.c.l.bf16 %v2985_v19  ;;  %v3003_v32 = vld [vmem:[%s2965_s25 + $0x30] sm:$0xff]   ;;  %v215_v33 = vunpack.c.h.bf16 %v2985_v19  ;;  %v3011_v36 = vld [vmem:[%s2965_s25 + $0x38] sm:$0xff]   ;;  %v3022_v40 = vld [vmem:[%s2965_s25 + $0x40] sm:$0xff]  }
  0x16   : > { %v867_v21 = vld [vmem:[#allocation2 + $0x8] sm:$0xff]  ;;  %v868_v22 = vld [vmem:[#allocation2 + $0x10] sm:$0xff]  ;;  %240 = vst.msk [vmem:[#allocation2 + $0x18] sm:$0xff] %vm204_vm1, %v208_v15  ;;  %241 = vst.msk [vmem:[#allocation2 + $0x20] sm:$0xff] %vm204_vm1, %v209_v16  ;;  %v216_v34 = vunpack.c.l.bf16 %v2988_v20  ;;  %v217_v35 = vunpack.c.h.bf16 %v2988_v20  ;;  %v218_v38 = vunpack.c.l.bf16 %v2994_v27  ;;  %v219_v39 = vunpack.c.h.bf16 %v2994_v27 }
  0x17   : > { %v899_v28 = vpack.c.bf16 %v868_v22, %v867_v21  ;;  %242 = vst.msk [vmem:[#allocation2 + $0x28] sm:$0xff] %vm204_vm1, %v210_v17  ;;  %243 = vst.msk [vmem:[#allocation2 + $0x30] sm:$0xff] %vm204_vm1, %v211_v18  ;;  %vm3024_vm3 = vcmp.gt.s32.totalorder %v323_v23, 0  ;;  %v351_v42 = vand.u32 15, %v279_v26  ;;  %v220_v43 = vunpack.c.l.bf16 %v3003_v32  ;;  %v3034_v45 = vld [vmem:[%s2965_s25 + $0x48] sm:$0xff]   ;;  %v3045_v50 = vld [vmem:[%s2965_s25 + $0x50] sm:$0xff]  }
  0x18   : > { %244 = vst.msk [vmem:[#allocation2 + $0x38] sm:$0xff] %vm204_vm1, %v212_v24  ;;  %245 = vst.msk [vmem:[#allocation2 + $0x40] sm:$0xff] %vm204_vm1, %v213_v25  ;;  %v221_v44 = vunpack.c.h.bf16 %v3003_v32  ;;  %vm3036_vm4 = vcmp.gt.s32.totalorder %v337_v29, 0  ;;  %v365_v47 = vand.u32 15, %v281_v31  ;;  %v222_v48 = vunpack.c.l.bf16 %v3011_v36  ;;  %v3114_v25 = vld [vmem:[%s2965_s25 + $0x58] sm:$0xff]  }
  0x19   : > { %2626 = vmatprep.mubr.msk.bf16.mxu1 %vm204_vm1, %v899_v28  ;;  %246 = vst.msk [vmem:[#allocation2 + $0x48] sm:$0xff] %vm204_vm1, %v214_v30  ;;  %247 = vst.msk [vmem:[#allocation2 + $0x50] sm:$0xff] %vm204_vm1, %v215_v33  ;;  %v223_v49 = vunpack.c.h.bf16 %v3011_v36  ;;  %v3050_v51 = vsel %vm3014_vm2, 1.0, %v3586_v5  ;;  %v224_v52 = vunpack.c.l.bf16 %v3022_v40  ;;  %v225_v53 = vunpack.c.h.bf16 %v3022_v40 }
  0x1a   : > { %248 = vst.msk [vmem:[#allocation2 + $0x58] sm:$0xff] %vm204_vm1, %v216_v34  ;;  %249 = vst.msk [vmem:[#allocation2 + $0x60] sm:$0xff] %vm204_vm1, %v217_v35  ;;  %v3061_v55 = vsel %vm3024_vm3, 1.0, %v3586_v5  ;;  %v226_v57 = vunpack.c.l.bf16 %v3034_v45  ;;  %v3072_v61 = vsel %vm3036_vm4, 1.0, %v3586_v5  ;;  %vm3074_vm5 = vcmp.gt.s32.totalorder %v351_v42, 0 }
  0x1b   : > { %250 = vst.msk [vmem:[#allocation2 + $0x68] sm:$0xff] %vm204_vm1, %v218_v38  ;;  %251 = vst.msk [vmem:[#allocation2 + $0x70] sm:$0xff] %vm204_vm1, %v219_v39  ;;  %v227_v63 = vunpack.c.h.bf16 %v3034_v45  ;;  %v228_v0 = vunpack.c.l.bf16 %v3045_v50  ;;  %vm3090_vm6 = vcmp.gt.s32.totalorder %v365_v47, 0  ;;  %v285_v10 = vadd.s32 96, %v2934_v4 }
  0x1c   : > { %252 = vst.msk [vmem:[#allocation2 + $0x78] sm:$0xff] %vm204_vm1, %v220_v43  ;;  %253 = vst.msk [vmem:[#allocation2 + $0x80] sm:$0xff] %vm204_vm1, %v221_v44  ;;  %v1822_v18 = vsel %vm971_vm0, %v2956_v8, 0  ;;  %v3111_v24 = vsel %vm3074_vm5, 1.0, %v3586_v5  ;;  %v3124_v31 = vsel %vm3090_vm6, 1.0, %v3586_v5  ;;  %v379_v33 = vand.u32 15, %v283_v56 }
  0x1d   : > { %254 = vst.msk [vmem:[#allocation2 + $0x88] sm:$0xff] %vm204_vm1, %v222_v48  ;;  %255 = vst.msk [vmem:[#allocation2 + $0x90] sm:$0xff] %vm204_vm1, %v223_v49  ;;  %v869_v58 = vld [vmem:[#allocation2 + $0x18] sm:$0xff]  ;;  %v870_v59 = vld [vmem:[#allocation2 + $0x20] sm:$0xff]  ;;  %v393_v37 = vand.u32 15, %v285_v10  ;;  %v229_v38 = vunpack.c.h.bf16 %v3045_v50  ;;  %v230_v43 = vunpack.c.l.bf16 %v3114_v25  ;;  %v289_v56 = vadd.s32 128, %v2934_v4 }
  0x1e   : > { %v3067_v60 = vld [vmem:[#allocation2 + $0x17] sm:$0xff]  ;;  %256 = vst.msk [vmem:[#allocation2 + $0x98] sm:$0xff] %vm204_vm1, %v224_v52  ;;  %257 = vst.msk [vmem:[#allocation2 + $0xa0] sm:$0xff] %vm204_vm1, %v225_v53  ;;  %v900_v1 = vpack.c.bf16 %v870_v59, %v869_v58  ;;  %v3082_v2 = vld [vmem:[#allocation2 + $0x1f] sm:$0xff]  ;;  %vm699_vm7 = vcmp.gt.s32.totalorder %v379_v33, 0  ;;  %v287_v53 = vadd.s32 112, %v2934_v4 }
  0x1f   : > { %v1385_v3 = vmul.f32 %v3050_v51, %v3067_v60  ;;  %v3086_v6 = vld [vmem:[#allocation2 + $0x27] sm:$0xff]  ;;  %v3088_v7 = vld [vmem:[#allocation2 + $0x2f] sm:$0xff]  ;;  %258 = vst.msk [vmem:[#allocation2 + $0xa8] sm:$0xff] %vm204_vm1, %v226_v57  ;;  %259 = vst.msk [vmem:[#allocation2 + $0xb0] sm:$0xff] %vm204_vm1, %v227_v63  ;;  %vm701_vm8 = vcmp.gt.s32.totalorder %v393_v37, 0  ;;  %v3160_v63 = vsel %vm699_vm7, 1.0, %v3586_v5 }
  0x20   : > { %v1387_v12 = vmul.f32 %v3061_v55, %v3086_v6  ;;  %v871_v15 = vld [vmem:[#allocation2 + $0x28] sm:$0xff]  ;;  %v872_v16 = vld [vmem:[#allocation2 + $0x30] sm:$0xff]  ;;  %260 = vst.msk [vmem:[#allocation2 + $0xb8] sm:$0xff] %vm204_vm1, %v228_v0  ;;  %2627 = vmatmul.mubr.msk.bf16.vlgmr.msra.gmra.mrb[0].mxu1 %vm204_vm1, %v900_v1  ;;  %v3106_v23 = vld [vmem:[#allocation2 + $0x3f] sm:$0xff]  ;;  %v3167_v10 = vsel %vm701_vm8, 1.0, %v3586_v5 }
  0x21   : > { %v1417_v17 = vpack.c.bf16 %v3082_v2, %v1385_v3  ;;  %v901_v21 = vpack.c.bf16 %v872_v16, %v871_v15  ;;  %v3104_v22 = vld [vmem:[#allocation2 + $0x37] sm:$0xff]  ;;  %3606 = vst [vmem:[#allocation3_spill] sm:$0xff] %v3114_v25  ;;  %2659 = vmatpush3.bf16.msra.mxu1 %v1190_v54  ;;  %v874_v29 = vld [vmem:[#allocation2 + $0x40] sm:$0xff]  ;;  %v875_v34 = vld [vmem:[#allocation2 + $0x48] sm:$0xff]  ;;  %v231_v54 = vunpack.c.h.bf16 %v3114_v25  ;;  %v407_v15 = vand.u32 15, %v287_v53 }
  0x22   : > { %v1418_v26 = vpack.c.bf16 %v3088_v7, %v1387_v12  ;;  %v873_v28 = vld [vmem:[#allocation2 + $0x38] sm:$0xff]  ;;  %v1389_v8 = vmul.f32 %v3072_v61, %v3104_v22  ;;  %v3119_v30 = vld [vmem:[#allocation2 + $0x47] sm:$0xff]  ;;  %v876_v35 = vld [vmem:[#allocation2 + $0x50] sm:$0xff]  ;;  %261 = vst.msk [vmem:[#allocation2 + $0xc0] sm:$0xff] %vm204_vm1, %v229_v38 }
  0x23   : > { %2694 = vmatprep.mubr.msk.bf16.mxu0 %vm204_vm1, %v1417_v17  ;;  %2630 = vmatprep.mubr.msk.bf16.mxu1 %vm204_vm1, %v901_v21  ;;  %v1391_v41 = vmul.f32 %v3111_v24, %v3119_v30  ;;  %v3133_v42 = vld [vmem:[#allocation2 + $0x57] sm:$0xff]  ;;  %v902_v44 = vpack.c.bf16 %v874_v29, %v873_v28  ;;  %v3136_v46 = vld [vmem:[#allocation2 + $0x4f] sm:$0xff]  ;;  %v3142_v48 = vld [vmem:[%s2965_s25 + $0x60] sm:$0xff]   ;;  %v903_v49 = vpack.c.bf16 %v876_v35, %v875_v34  ;;  %vm703_vm9 = vcmp.gt.s32.totalorder %v407_v15, 0 }
  0x24   : > { %2695 = vmatmul.mubr.msk.bf16.vlgmr.msra.gmra.mrb[0].mxu0 %vm204_vm1, %v1418_v26  ;;  %v1419_v39 = vpack.c.bf16 %v3106_v23, %v1389_v8  ;;  %v1393_v47 = vmul.f32 %v3124_v31, %v3133_v42  ;;  %3607 = vst [vmem:[#allocation4_spill] sm:$0xff] %v3142_v48  ;;  %v3145_v52 = vld [vmem:[#allocation2 + $0x5f] sm:$0xff]  ;;  %262 = vst.msk [vmem:[#allocation2 + $0xc8] sm:$0xff] %vm204_vm1, %v230_v43  ;;  %v232_v58 = vunpack.c.l.bf16 %v3142_v48  ;;  %v3155_v59 = vld [vmem:[%s2965_s25 + $0x68] sm:$0xff]   ;;  %v233_v1 = vunpack.c.h.bf16 %v3142_v48 }
  0x25   : > { %2727 = vmatpush3.bf16.msra.mxu0 %v1822_v18  ;;  %v1420_v57 = vpack.c.bf16 %v3136_v46, %v1391_v41  ;;  %263 = vst.msk [vmem:[#allocation2 + $0xd0] sm:$0xff] %vm204_vm1, %v231_v54  ;;  %3608 = vst [vmem:[#allocation5_spill] sm:$0xff] %v3155_v59  ;;  %v3162_v0 = vld [vmem:[#allocation2 + $0x67] sm:$0xff]  ;;  %v877_v3 = vld [vmem:[#allocation2 + $0x58] sm:$0xff]  ;;  %v421_v18 = vand.u32 15, %v289_v56  ;;  %v234_v21 = vunpack.c.l.bf16 %v3155_v59  ;;  %v235_v26 = vunpack.c.h.bf16 %v3155_v59 }
  0x26   : > { %2698 = vmatprep.mubr.msk.bf16.mxu0 %vm204_vm1, %v1419_v39  ;;  %v1421_v62 = vpack.c.bf16 %v3145_v52, %v1393_v47  ;;  %v878_v9 = vld [vmem:[#allocation2 + $0x60] sm:$0xff]  ;;  %v3169_v12 = vld [vmem:[#allocation2 + $0x77] sm:$0xff]  ;;  %264 = vst.msk [vmem:[#allocation2 + $0xd8] sm:$0xff] %vm204_vm1, %v232_v58  ;;  %v879_v16 = vld [vmem:[#allocation2 + $0x68] sm:$0xff]  ;;  %v1395_v29 = vmul.f32 %v3160_v63, %v3162_v0  ;;  %v291_v39 = vadd.s32 144, %v2934_v4  ;;  %v295_v54 = vadd.s32 176, %v2934_v4 }
  0x27   : > { %v880_v17 = vld [vmem:[#allocation2 + $0x70] sm:$0xff]  ;;  %265 = vst.msk [vmem:[#allocation2 + $0xe0] sm:$0xff] %vm204_vm1, %v233_v1  ;;  %v3182_v8 = vld [vmem:[%s2965_s25 + $0x78] sm:$0xff]   ;;  %v904_v33 = vpack.c.bf16 %v878_v9, %v877_v3  ;;  %v1397_v35 = vmul.f32 %v3167_v10, %v3169_v12  ;;  %266 = vst.msk [vmem:[#allocation2 + $0xe8] sm:$0xff] %vm204_vm1, %v234_v21  ;;  %vm3195_vm10 = vcmp.gt.s32.totalorder %v421_v18, 0 }
  0x28   : > { %2631 = vmatmul.mubr.msk.bf16.gmra.mrb[4].mxu1 %vm204_vm1, %v902_v44  ;;  %v3176_v28 = vld [vmem:[%s2965_s25 + $0x70] sm:$0xff]   ;;  %3610 = vst [vmem:[#allocation7_spill] sm:$0xff] %v3182_v8  ;;  %267 = vst.msk [vmem:[#allocation2 + $0xf0] sm:$0xff] %vm204_vm1, %v235_v26  ;;  %v905_v37 = vpack.c.bf16 %v880_v17, %v879_v16  ;;  %v3191_v38 = vld [vmem:[#allocation2 + $0x7f] sm:$0xff]  ;;  %v293_v44 = vadd.s32 160, %v2934_v4  ;;  %v3217_v9 = vsel %vm3195_vm10, 1.0, %v3586_v5 }
  0x29   : > { %2634 = vmatprep.mubr.msk.bf16.mxu1 %vm204_vm1, %v903_v49  ;;  %3609 = vst [vmem:[#allocation6_spill] sm:$0xff] %v3176_v28  ;;  %v3185_v34 = vld [vmem:[#allocation2 + $0x6f] sm:$0xff]  ;;  %v236_v41 = vunpack.c.l.bf16 %v3176_v28  ;;  %v237_v47 = vunpack.c.h.bf16 %v3176_v28  ;;  %v238_v49 = vunpack.c.l.bf16 %v3182_v8  ;;  %v1423_v56 = vpack.c.bf16 %v3191_v38, %v1397_v35  ;;  %v3208_v58 = vld [vmem:[#allocation2 + $0x87] sm:$0xff]  ;;  %v881_v1 = vld [vmem:[#allocation2 + $0x78] sm:$0xff] }
  0x2a   : > { %v1422_v53 = vpack.c.bf16 %v3185_v34, %v1395_v29  ;;  %v882_v3 = vld [vmem:[#allocation2 + $0x80] sm:$0xff]  ;;  %v1369_v15 = vld [vmem:[#allocation2 + $0x97] sm:$0xff]  ;;  %v435_v16 = vand.u32 15, %v291_v39  ;;  %v299_v17 = vadd.s32 208, %v2934_v4  ;;  %v883_v18 = vld [vmem:[#allocation2 + $0x88] sm:$0xff]  ;;  %v449_v26 = vand.u32 15, %v293_v44 }
  0x2b   : > { %268 = vst.msk [vmem:[#allocation2 + $0xf8] sm:$0xff] %vm204_vm1, %v236_v41  ;;  %269 = vst.msk [vmem:[#allocation2 + $0x100] sm:$0xff] %vm204_vm1, %v237_v47  ;;  %v884_v21 = vld [vmem:[#allocation2 + $0x90] sm:$0xff]  ;;  %v303_v29 = vadd.s32 240, %v2934_v4  ;;  %v463_v35 = vand.u32 15, %v295_v54  ;;  %v906_v41 = vpack.c.bf16 %v882_v3, %v881_v1  ;;  %v1401_v43 = vmul.f32 %v3217_v9, %v1369_v15  ;;  %v3232_v47 = vld [vmem:[#allocation2 + $0x9f] sm:$0xff] }
  0x2c   : > { %2699 = vmatmul.mubr.msk.bf16.gmra.mrb[4].mxu0 %vm204_vm1, %v1420_v57  ;;  %v2387_v57 = vsel %vm703_vm9, 1.0, %v3586_v5  ;;  %270 = vst.msk [vmem:[#allocation2 + $0x108] sm:$0xff] %vm204_vm1, %v238_v49  ;;  %v3229_v39 = vld [vmem:[#allocation2 + $0x8f] sm:$0xff]  ;;  %v907_v44 = vpack.c.bf16 %v884_v21, %v883_v18  ;;  %vm707_vm11 = vcmp.gt.s32.totalorder %v435_v16, 0  ;;  %v491_v49 = vand.u32 15, %v299_v17  ;;  %v3252_v17 = vld [vmem:[#allocation2 + $0xa7] sm:$0xff] }
  0x2d   : > { %2702 = vmatprep.mubr.msk.bf16.mxu0 %vm204_vm1, %v1421_v62  ;;  %v239_v62 = vunpack.c.h.bf16 %v3182_v8  ;;  %vm709_vm12 = vcmp.gt.s32.totalorder %v449_v26, 0  ;;  %v297_v54 = vadd.s32 192, %v2934_v4  ;;  %vm3242_vm13 = vcmp.gt.s32.totalorder %v463_v35, 0  ;;  %v886_v18 = vld [vmem:[#allocation2 + $0xa0] sm:$0xff]  ;;  %v3276_v26 = vld [vmem:[#allocation2 + $0xaf] sm:$0xff] }
  0x2e   : > { %v3247_v1 = vmul.f32 %v2387_v57, %v3169_v12  ;;  %v1425_v3 = vpack.c.bf16 %v3232_v47, %v1401_v43  ;;  %v2389_v16 = vsel %vm707_vm11, 1.0, %v3586_v5  ;;  %v3258_v21 = vsel %vm709_vm12, 1.0, %v3586_v5  ;;  %v1373_v12 = vld [vmem:[#allocation2 + $0xb7] sm:$0xff]  ;;  %v3291_v8 = vld [vmem:[#allocation2 + $0xdf] sm:$0xff]  ;;  %v891_v48 = vld [vmem:[#allocation2 + $0xc8] sm:$0xff] }
  0x2f   : > { %271 = vst.msk [vmem:[#allocation2 + $0x110] sm:$0xff] %vm204_vm1, %v239_v62  ;;  %vm3260_vm14 = vcmp.gt.s32.totalorder %v491_v49, 0  ;;  %v2391_v35 = vsel %vm3242_vm13, 1.0, %v3586_v5  ;;  %v3269_v43 = vmul.f32 %v2389_v16, %v1369_v15  ;;  %v1405_v62 = vmul.f32 %v3258_v21, %v1373_v12  ;;  %v1377_v5 = vld [vmem:[#allocation2 + $0xd7] sm:$0xff] }
  0x30   : > { %2635 = vmatmul.mubr.msk.bf16.gmra.mrb[8].mxu1 %vm204_vm1, %v904_v33  ;;  %v1399_v33 = vmul.f32 %v2387_v57, %v3208_v58  ;;  %v3273_v49 = vmul.f32 %v2391_v35, %v1373_v12  ;;  %v301_v12 = vadd.s32 224, %v2934_v4  ;;  %v889_v4 = vld [vmem:[#allocation2 + $0xb8] sm:$0xff]  ;;  %v892_v25 = vld [vmem:[#allocation2 + $0xd0] sm:$0xff] }
  0x31   : > { %2638 = vmatprep.mubr.msk.bf16.mxu1 %vm204_vm1, %v905_v37  ;;  %v3226_v37 = vmul.f32 %v3111_v24, %v3104_v22  ;;  %v519_v22 = vand.u32 15, %v303_v29  ;;  %v3239_v24 = vmul.f32 %v3160_v63, %v3133_v42  ;;  %v885_v63 = vld [vmem:[#allocation2 + $0x98] sm:$0xff]  ;;  %v887_v29 = vld [vmem:[#allocation2 + $0xa8] sm:$0xff] }
  0x32   : > { %3617 = vst [vmem:[#allocation8_spill] sm:$0xff] %v3273_v49  ;;  %v908_v42 = vpack.c.bf16 %v886_v18, %v885_v63  ;;  %v3297_v59 = vld [vmem:[#allocation2 + $0xff] sm:$0xff]  ;;  %v505_v49 = vand.u32 15, %v301_v12  ;;  %v3320_v12 = vld [vmem:[#allocation2 + $0xe7] sm:$0xff] }
  0x33   : > { %vm719_vm15 = vcmp.gt.s32.totalorder %v519_v22, 0  ;;  %v890_v22 = vld [vmem:[#allocation2 + $0xc0] sm:$0xff] }
  0x34   : > { %2703 = vmatmul.mubr.msk.bf16.gmra.mrb[8].mxu0 %vm204_vm1, %v1422_v53  ;;  %v3278_v53 = vld [vmem:[#allocation2 + $0xbf] sm:$0xff]  ;;  %vm717_vm2 = vcmp.gt.s32.totalorder %v505_v49, 0 }
  0x35   : > { %2706 = vmatprep.mubr.msk.bf16.mxu0 %vm204_vm1, %v1423_v56  ;;  %v1424_v56 = vpack.c.bf16 %v3229_v39, %v1399_v33  ;;  %v888_v33 = vld [vmem:[#allocation2 + $0xb0] sm:$0xff] }
  0x38   : > { %2639 = vmatmul.mubr.msk.bf16.gmra.mrb[12].mxu1 %vm204_vm1, %v906_v41  ;;  %v477_v41 = vand.u32 15, %v297_v54  ;;  %v3618_v54 = vmov 0.0  }
  0x39   : > { %2642 = vmatprep.mubr.msk.bf16.mxu1 %vm204_vm1, %v907_v44  ;;  %v1403_v44 = vmul.f32 %v2389_v16, %v3252_v17  ;;  %v2393_v15 = vsel %vm3260_vm14, 1.0, %v3618_v54  ;;  %v1381_v16 = vld [vmem:[#allocation2 + $0xf7] sm:$0xff]  ;;  %v2395_v63 = vsel %vm719_vm15, 1.0, %v3618_v54 }
  0x3a   : > { %v3289_v18 = vmul.f32 %v2393_v15, %v1377_v5  ;;  %vm713_vm0 = vcmp.gt.s32.totalorder %v477_v41, 0  ;;  %v3294_v28 = vmul.f32 %v2395_v63, %v1381_v16 }
  0x3b   : > { %v1426_v57 = vpack.c.bf16 %v3276_v26, %v1403_v44  ;;  %v3309_v44 = vsel %vm713_vm0, 1.0, %v3618_v54 }
  0x3c   : > { %2707 = vmatmul.mubr.msk.bf16.gmra.mrb[12].mxu0 %vm204_vm1, %v1424_v56  ;;  %v909_v56 = vpack.c.bf16 %v888_v33, %v887_v29  ;;  %3619 = vst [vmem:[#allocation9_spill] sm:$0xff] %v3289_v18  ;;  %3620 = vst [vmem:[#allocation10_spill] sm:$0xff] %v3294_v28  ;;  %v1427_v33 = vpack.c.bf16 %v3278_v53, %v1405_v62  ;;  %v910_v62 = vpack.c.bf16 %v890_v22, %v889_v4  ;;  %v3314_v29 = vld [vmem:[#allocation2 + $0xcf] sm:$0xff]  ;;  %v894_v22 = vld [vmem:[#allocation2 + $0xe0] sm:$0xff] }
  0x3d   : > { %2710 = vmatprep.mubr.msk.bf16.mxu0 %vm204_vm1, %v1425_v3  ;;  %v3303_v3 = vld [vmem:[#allocation2 + $0xc7] sm:$0xff]  ;;  %v1409_v41 = vmul.f32 %v3309_v44, %v1377_v5  ;;  %v896_v4 = vld [vmem:[#allocation2 + $0xf0] sm:$0xff]  ;;  %v1411_v5 = vmul.f32 %v2393_v15, %v3320_v12  ;;  %v897_v15 = vld [vmem:[#allocation2 + $0xf8] sm:$0xff] }
  0x3f   : > { %v1429_v18 = vpack.c.bf16 %v3291_v8, %v1409_v41 }
  0x40   : > { %2643 = vmatmul.mubr.msk.bf16.gmra.mrb[16].mxu1 %vm204_vm1, %v908_v42  ;;  %v1407_v42 = vmul.f32 %v2391_v35, %v3303_v3  ;;  %v893_v35 = vld [vmem:[#allocation2 + $0xd8] sm:$0xff] }
  0x41   : > { %2646 = vmatprep.mubr.msk.bf16.mxu1 %vm204_vm1, %v909_v56  ;;  %v911_v56 = vpack.c.bf16 %v892_v25, %v891_v48  ;;  %v912_v25 = vpack.c.bf16 %v894_v22, %v893_v35  ;;  %v3329_v48 = vld [vmem:[#allocation2 + $0xef] sm:$0xff]  ;;  %v898_v35 = vld [vmem:[#allocation2 + $0x100] sm:$0xff] }
  0x42   : > { %v1428_v28 = vpack.c.bf16 %v3314_v29, %v1407_v42  ;;  %v785_v42 = vld [vmem:[#allocation2 + $0x7] sm:$0xff] }
  0x44   : > { %2711 = vmatmul.mubr.msk.bf16.gmra.mrb[16].mxu0 %vm204_vm1, %v1426_v57  ;;  %v3324_v57 = vsel %vm717_vm2, 1.0, %v3618_v54 }
  0x45   : > { %2714 = vmatprep.mubr.msk.bf16.mxu0 %vm204_vm1, %v1427_v33  ;;  %v895_v33 = vld [vmem:[#allocation2 + $0xe8] sm:$0xff]  ;;  %v1413_v49 = vmul.f32 %v3324_v57, %v1381_v16  ;;  %v914_v16 = vpack.c.bf16 %v898_v35, %v897_v15 }
  0x46   : > { %v913_v41 = vpack.c.bf16 %v896_v4, %v895_v33  ;;  %v1384_v33 = vld [vmem:[#allocation2 + $0x10f] sm:$0xff] }
  0x47   : > { %v1431_v54 = vpack.c.bf16 %v3297_v59, %v1413_v49 }
  0x48   : > { %2647 = vmatmul.mubr.msk.bf16.gmra.mrb[20].mxu1 %vm204_vm1, %v910_v62  ;;  %v1430_v62 = vpack.c.bf16 %v3329_v48, %v1411_v5 }
  0x49   : > { %2650 = vmatprep.mubr.msk.bf16.mxu1 %vm204_vm1, %v911_v56  ;;  %v1383_v56 = vld [vmem:[#allocation2 + $0x107] sm:$0xff] }
  0x4a   : > { %v1415_v22 = vmul.f32 %v2395_v63, %v1383_v56 }
  0x4c   : > { %2715 = vmatmul.mubr.msk.bf16.gmra.mrb[20].mxu0 %vm204_vm1, %v1428_v28  ;;  %v817_v28 = vmul.f32 %v3050_v51, %v785_v42  ;;  %v1432_v5 = vpack.c.bf16 %v1384_v33, %v1415_v22  ;;  %v821_v51 = vmul.f32 %v3072_v61, %v3086_v6  ;;  %v829_v61 = vmul.f32 %v3167_v10, %v3162_v0  ;;  %v3631_v0 = vld [vmem:[#allocation5_spill] sm:$0xff]  ;;  %v3632_v10 = vld [vmem:[#allocation6_spill] sm:$0xff] }
  0x4d   : > { %2718 = vmatprep.mubr.msk.bf16.mxu0 %vm204_vm1, %v1429_v18  ;;  %v786_v18 = vld [vmem:[#allocation2 + $0xf] sm:$0xff]  ;;  %v837_v6 = vmul.f32 %v3258_v21, %v3252_v17 }
  0x4e   : > { %v849_v4 = vpack.c.bf16 %v786_v18, %v817_v28  ;;  %v851_v49 = vpack.c.bf16 %v3088_v7, %v821_v51  ;;  %v841_v7 = vmul.f32 %v3309_v44, %v3303_v3 }
  0x50   : > { %2651 = vmatmul.mubr.msk.bf16.gmra.mrb[24].mxu1 %vm204_vm1, %v912_v25  ;;  %v819_v25 = vmul.f32 %v3061_v55, %v3067_v60  ;;  %v825_v55 = vmul.f32 %v3124_v31, %v3119_v30  ;;  %v845_v30 = vmul.f32 %v3324_v57, %v3320_v12  ;;  %v3627_v31 = vld [vmem:[#allocation3_spill] sm:$0xff] }
  0x51   : > { %2654 = vmatprep.mubr.msk.bf16.mxu1 %vm204_vm1, %v913_v41 }
  0x52   : > { %v850_v63 = vpack.c.bf16 %v3082_v2, %v819_v25  ;;  %v853_v60 = vpack.c.bf16 %v3136_v46, %v825_v55  ;;  %v833_v2 = vmul.f32 %v3217_v9, %v3208_v58  ;;  %v3628_v46 = vld [vmem:[#allocation4_spill] sm:$0xff]  ;;  %v3635_v58 = vld [vmem:[#allocation7_spill] sm:$0xff] }
  0x54   : > { %2719 = vmatmul.mubr.msk.bf16.gmra.mrb[24].mxu0 %vm204_vm1, %v1430_v62 }
  0x55   : > { %2722 = vmatprep.mubr.msk.bf16.mxu0 %vm204_vm1, %v1431_v54 }
  0x58   : > { %2655 = vmatmul.mubr.msk.bf16.gmra.mrb[28].mxu1 %vm204_vm1, %v914_v16 }
  0x59   : > { %2660 = vmatprep.mubr.msk.bf16.mxu1 %vm204_vm1, %v849_v4 }
  0x5c   : > { %2723 = vmatmul.mubr.msk.bf16.gmra.mrb[28].mxu0 %vm204_vm1, %v1432_v5 }
  0x5d   : > { %2728 = vmatprep.mubr.msk.bf16.mxu0 %vm204_vm1, %v2971_v11  ;;  %v3621_v11 = vpack.c.bf16 %v3106_v23, %v3226_v37 }
  0x60   : > { %2661 = vmatmul.mubr.msk.bf16.vlgmr.msra.gmra.mrb[0].mxu1 %vm204_vm1, %v850_v63 }
  0x61   : > { %2664 = vmatprep.mubr.msk.bf16.mxu1 %vm204_vm1, %v851_v49 }
  0x64   : > { %2729 = vmatmul.mubr.msk.bf16.vlgmr.msra.gmra.mrb[0].mxu0 %vm204_vm1, %v2975_v13  ;;  %v855_v13 = vpack.c.bf16 %v3185_v34, %v829_v61  ;;  %v3633_v34 = vld [vmem:[#allocation10_spill] sm:$0xff] }
  0x65   : > { %2732 = vmatprep.mubr.msk.bf16.mxu0 %vm204_vm1, %v2978_v14  ;;  %v3622_v14 = vpack.c.bf16 %v3145_v52, %v3239_v24 }
  0x68   : > { %2665 = vmatmul.mubr.msk.bf16.gmra.mrb[4].mxu1 %vm204_vm1, %v3621_v11 }
  0x69   : > { %2668 = vmatprep.mubr.msk.bf16.mxu1 %vm204_vm1, %v853_v60 }
  0x6c   : > { %2733 = vmatmul.mubr.msk.bf16.gmra.mrb[4].mxu0 %vm204_vm1, %v2985_v19  ;;  %v857_v19 = vpack.c.bf16 %v3229_v39, %v833_v2 }
  0x6d   : > { %2736 = vmatprep.mubr.msk.bf16.mxu0 %vm204_vm1, %v2988_v20  ;;  %v3623_v20 = vpack.c.bf16 %v3191_v38, %v3247_v1  ;;  %v3634_v38 = vpack.c.bf16 %v3297_v59, %v3633_v34  ;;  %v3442_v59 = vld [vmem:[%s3584_s2 + $0x1] ss:$0 sm:$0xff] }
  0x70   : > { %2669 = vmatmul.mubr.msk.bf16.gmra.mrb[8].mxu1 %vm204_vm1, %v3622_v14 }
  0x71   : > { %2672 = vmatprep.mubr.msk.bf16.mxu1 %vm204_vm1, %v855_v13 }
  0x74   : > { %2737 = vmatmul.mubr.msk.bf16.gmra.mrb[8].mxu0 %vm204_vm1, %v2994_v27  ;;  %v859_v27 = vpack.c.bf16 %v3276_v26, %v837_v6 }
  0x75   : > { %2740 = vmatprep.mubr.msk.bf16.mxu0 %vm204_vm1, %v3003_v32  ;;  %v3624_v32 = vpack.c.bf16 %v3232_v47, %v3269_v43 }
  0x78   : > { %2673 = vmatmul.mubr.msk.bf16.gmra.mrb[12].mxu1 %vm204_vm1, %v3623_v20 }
  0x79   : > { %2676 = vmatprep.mubr.msk.bf16.mxu1 %vm204_vm1, %v857_v19 }
  0x7c   : > { %2741 = vmatmul.mubr.msk.bf16.gmra.mrb[12].mxu0 %vm204_vm1, %v3011_v36  ;;  %v861_v36 = vpack.c.bf16 %v3314_v29, %v841_v7 }
  0x7d   : > { %2744 = vmatprep.mubr.msk.bf16.mxu0 %vm204_vm1, %v3022_v40  ;;  %v3625_v40 = vld [vmem:[#allocation8_spill] sm:$0xff] }
  0x7e   : > { %v3626_v23 = vpack.c.bf16 %v3278_v53, %v3625_v40  ;;  %v3437_v53 = vld [vmem:[%s3584_s2] ss:$0 sm:$0xff] }
  0x80   : > { %2677 = vmatmul.mubr.msk.bf16.gmra.mrb[16].mxu1 %vm204_vm1, %v3624_v32 }
  0x81   : > { %2680 = vmatprep.mubr.msk.bf16.mxu1 %vm204_vm1, %v859_v27 }
  0x84   : > { %2745 = vmatmul.mubr.msk.bf16.gmra.mrb[16].mxu0 %vm204_vm1, %v3034_v45  ;;  %v863_v45 = vpack.c.bf16 %v3329_v48, %v845_v30 }
  0x85   : > { %2748 = vmatprep.mubr.msk.bf16.mxu0 %vm204_vm1, %v3045_v50  ;;  %v3629_v50 = vld [vmem:[#allocation9_spill] sm:$0xff] }
  0x86   : > { %v3630_v52 = vpack.c.bf16 %v3291_v8, %v3629_v50 }
  0x88   : > { %2681 = vmatmul.mubr.msk.bf16.gmra.mrb[20].mxu1 %vm204_vm1, %v3626_v23 }
  0x89   : > { %2684 = vmatprep.mubr.msk.bf16.mxu1 %vm204_vm1, %v861_v36 }
  0x8c   : > { %2749 = vmatmul.mubr.msk.bf16.gmra.mrb[20].mxu0 %vm204_vm1, %v3627_v31 }
  0x8d   : > { %2752 = vmatprep.mubr.msk.bf16.mxu0 %vm204_vm1, %v3628_v46 }
  0x90   : > { %2685 = vmatmul.mubr.msk.bf16.gmra.mrb[24].mxu1 %vm204_vm1, %v3630_v52 }
  0x91   : > { %2688 = vmatprep.mubr.msk.bf16.mxu1 %vm204_vm1, %v863_v45 }
  0x94   : > { %2753 = vmatmul.mubr.msk.bf16.gmra.mrb[24].mxu0 %vm204_vm1, %v3631_v0 }
  0x95   : > { %2756 = vmatprep.mubr.msk.bf16.mxu0 %vm204_vm1, %v3632_v10 }
  0x98   : > { %2689 = vmatmul.mubr.msk.bf16.gmra.mrb[28].mxu1 %vm204_vm1, %v3634_v38 }
  0x9c   : > { %2757 = vmatmul.mubr.msk.bf16.gmra.mrb[28].mxu0 %vm204_vm1, %v3635_v58  ;;  %vm2283_vm1 = vcmask 257024  }
 0x133   : > { %v2662_v9 = vpop.f32.mrb[0].mxu1 }
 0x134   : > { %v1226_v8 = vpop.f32.mrb[1].mxu1 }
 0x135   : > { %v2663_v37 = vpop.f32.mrb[2].mxu1 }
 0x136   : > { %v1229_v39 = vpop.f32.mrb[3].mxu1 }
 0x137   : > { %v2730_v47 = vpop.f32.mrb[0].mxu0 }
 0x138   : > { %v2760_v24 = vadd.f32 %v2730_v47, %v2662_v9  ;;  %v1858_v1 = vpop.f32.mrb[1].mxu0 }
 0x139   : > { %v2761_v17 = vadd.f32 %v1858_v1, %v1226_v8  ;;  %v2731_v21 = vpop.f32.mrb[2].mxu0 }
 0x13a   : > { %v2024_v26 = vmul.f32 %v2760_v24, %v3437_v53  ;;  %v2762_v43 = vadd.f32 %v2731_v21, %v2663_v37  ;;  %v1861_v3 = vpop.f32.mrb[3].mxu0 }
 0x13b   : > { %v2022_v29 = vmul.f32 %v2761_v17, %v3437_v53  ;;  %v2763_v44 = vadd.f32 %v1861_v3, %v1229_v39  ;;  %v2666_v48 = vpop.f32.mrb[4].mxu1 }
 0x13c   : > { %v2061_v12 = vadd.f32 %v3442_v59, %v2024_v26  ;;  %v2025_v57 = vmul.f32 %v2762_v43, %v3437_v53  ;;  %v1242_v62 = vpop.f32.mrb[5].mxu1 }
 0x13d   : > { %v2059_v41 = vadd.f32 %v3442_v59, %v2022_v29  ;;  %v2023_v42 = vmul.f32 %v2763_v44, %v3437_v53  ;;  %v2667_v28 = vpop.f32.mrb[6].mxu1 }
 0x13e   : > { %v2093_v54 = vmax.f32 %v2061_v12, 0.0  ;;  %v2062_v56 = vadd.f32 %v3442_v59, %v2025_v57  ;;  %v1245_v18 = vpop.f32.mrb[7].mxu1 }
 0x13f   : > { %v2091_v15 = vmax.f32 %v2059_v41, 0.0  ;;  %v2060_v35 = vadd.f32 %v3442_v59, %v2023_v42  ;;  %v2734_v22 = vpop.f32.mrb[4].mxu0 }
 0x140   : > { %v2125_v16 = vmin.f32 %v2093_v54, 6.0  ;;  %v2094_v33 = vmax.f32 %v2062_v56, 0.0  ;;  %v2764_v4 = vadd.f32 %v2734_v22, %v2666_v48  ;;  %v1874_v5 = vpop.f32.mrb[5].mxu0 }
 0x141   : > { %v2123_v25 = vmin.f32 %v2091_v15, 6.0  ;;  %v2092_v51 = vmax.f32 %v2060_v35, 0.0  ;;  %v2765_v63 = vadd.f32 %v1874_v5, %v1242_v62  ;;  %v2735_v49 = vpop.f32.mrb[6].mxu0 }
 0x142   : > { %v2526_v55 = vpack.c.bf16 %v2125_v16, %v2125_v16  ;;  %v2126_v60 = vmin.f32 %v2094_v33, 6.0  ;;  %v2028_v11 = vmul.f32 %v2764_v4, %v3437_v53  ;;  %v2766_v61 = vadd.f32 %v2735_v49, %v2667_v28  ;;  %v1877_v13 = vpop.f32.mrb[7].mxu0 }
 0x143   : > { %v2524_v14 = vpack.c.bf16 %v2123_v25, %v2123_v25  ;;  %v2124_v2 = vmin.f32 %v2092_v51, 6.0  ;;  %v2026_v19 = vmul.f32 %v2765_v63, %v3437_v53  ;;  %v2767_v20 = vadd.f32 %v1877_v13, %v1245_v18  ;;  %v2670_v7 = vpop.f32.mrb[8].mxu1 }
 0x144   : > { %2286 = vst.msk [vmem:[%s3457_s5 + $0x8] sm:$0xf] %vm2283_vm1, %v2526_v55  ;;  %v2527_v6 = vpack.c.bf16 %v2126_v60, %v2126_v60  ;;  %v2065_v27 = vadd.f32 %v3442_v59, %v2028_v11  ;;  %v2029_v32 = vmul.f32 %v2766_v61, %v3437_v53  ;;  %v1258_v30 = vpop.f32.mrb[9].mxu1 }
 0x145   : > { %2284 = vst.msk [vmem:[%s3457_s5] sm:$0xf] %vm2283_vm1, %v2524_v14  ;;  %v2525_v36 = vpack.c.bf16 %v2124_v2, %v2124_v2  ;;  %v2063_v40 = vadd.f32 %v3442_v59, %v2026_v19  ;;  %v2027_v23 = vmul.f32 %v2767_v20, %v3437_v53  ;;  %v2671_v45 = vpop.f32.mrb[10].mxu1 }
 0x146   : > { %2287 = vst.msk [vmem:[%s3457_s5 + $0xc] sm:$0xf] %vm2283_vm1, %v2527_v6  ;;  %v2097_v31 = vmax.f32 %v2065_v27, 0.0  ;;  %v2066_v46 = vadd.f32 %v3442_v59, %v2029_v32  ;;  %v1261_v0 = vpop.f32.mrb[11].mxu1 }
 0x147   : > { %2285 = vst.msk [vmem:[%s3457_s5 + $0x4] sm:$0xf] %vm2283_vm1, %v2525_v36  ;;  %v2095_v50 = vmax.f32 %v2063_v40, 0.0  ;;  %v2064_v52 = vadd.f32 %v3442_v59, %v2027_v23  ;;  %v2738_v10 = vpop.f32.mrb[8].mxu0 }
 0x148   : > { %v2129_v34 = vmin.f32 %v2097_v31, 6.0  ;;  %v2098_v38 = vmax.f32 %v2066_v46, 0.0  ;;  %v2768_v58 = vadd.f32 %v2738_v10, %v2670_v7  ;;  %v1890_v9 = vpop.f32.mrb[9].mxu0 }
 0x149   : > { %v2127_v8 = vmin.f32 %v2095_v50, 6.0  ;;  %v2096_v37 = vmax.f32 %v2064_v52, 0.0  ;;  %v2769_v39 = vadd.f32 %v1890_v9, %v1258_v30  ;;  %v2739_v47 = vpop.f32.mrb[10].mxu0 }
 0x14a   : > { %v2530_v24 = vpack.c.bf16 %v2129_v34, %v2129_v34  ;;  %v2130_v1 = vmin.f32 %v2098_v38, 6.0  ;;  %v2032_v17 = vmul.f32 %v2768_v58, %v3437_v53  ;;  %v2770_v21 = vadd.f32 %v2739_v47, %v2671_v45  ;;  %v1893_v26 = vpop.f32.mrb[11].mxu0 }
 0x14b   : > { %v2528_v43 = vpack.c.bf16 %v2127_v8, %v2127_v8  ;;  %v2128_v3 = vmin.f32 %v2096_v37, 6.0  ;;  %v2030_v29 = vmul.f32 %v2769_v39, %v3437_v53  ;;  %v2771_v44 = vadd.f32 %v1893_v26, %v1261_v0  ;;  %v2674_v41 = vpop.f32.mrb[12].mxu1 }
 0x14c   : > { %2290 = vst.msk [vmem:[%s3457_s5 + $0x18] sm:$0xf] %vm2283_vm1, %v2530_v24  ;;  %v2531_v12 = vpack.c.bf16 %v2130_v1, %v2130_v1  ;;  %v2069_v57 = vadd.f32 %v3442_v59, %v2032_v17  ;;  %v2033_v48 = vmul.f32 %v2770_v21, %v3437_v53  ;;  %v1274_v56 = vpop.f32.mrb[13].mxu1 }
 0x14d   : > { %2288 = vst.msk [vmem:[%s3457_s5 + $0x10] sm:$0xf] %vm2283_vm1, %v2528_v43  ;;  %v2529_v42 = vpack.c.bf16 %v2128_v3, %v2128_v3  ;;  %v2067_v62 = vadd.f32 %v3442_v59, %v2030_v29  ;;  %v2031_v54 = vmul.f32 %v2771_v44, %v3437_v53  ;;  %v2675_v35 = vpop.f32.mrb[14].mxu1 }
 0x14e   : > { %2291 = vst.msk [vmem:[%s3457_s5 + $0x1c] sm:$0xf] %vm2283_vm1, %v2531_v12  ;;  %v2101_v28 = vmax.f32 %v2069_v57, 0.0  ;;  %v2070_v15 = vadd.f32 %v3442_v59, %v2033_v48  ;;  %v1277_v16 = vpop.f32.mrb[15].mxu1 }
 0x14f   : > { %2289 = vst.msk [vmem:[%s3457_s5 + $0x14] sm:$0xf] %vm2283_vm1, %v2529_v42  ;;  %v2099_v18 = vmax.f32 %v2067_v62, 0.0  ;;  %v2068_v22 = vadd.f32 %v3442_v59, %v2031_v54  ;;  %v2742_v33 = vpop.f32.mrb[12].mxu0 }
 0x150   : > { %v2133_v4 = vmin.f32 %v2101_v28, 6.0  ;;  %v2102_v5 = vmax.f32 %v2070_v15, 0.0  ;;  %v2772_v25 = vadd.f32 %v2742_v33, %v2674_v41  ;;  %v1906_v51 = vpop.f32.mrb[13].mxu0 }
 0x151   : > { %v2131_v63 = vmin.f32 %v2099_v18, 6.0  ;;  %v2100_v49 = vmax.f32 %v2068_v22, 0.0  ;;  %v2773_v55 = vadd.f32 %v1906_v51, %v1274_v56  ;;  %v2743_v60 = vpop.f32.mrb[14].mxu0 }
 0x152   : > { %v2534_v11 = vpack.c.bf16 %v2133_v4, %v2133_v4  ;;  %v2134_v61 = vmin.f32 %v2102_v5, 6.0  ;;  %v2036_v13 = vmul.f32 %v2772_v25, %v3437_v53  ;;  %v2774_v14 = vadd.f32 %v2743_v60, %v2675_v35  ;;  %v1909_v2 = vpop.f32.mrb[15].mxu0 }
 0x153   : > { %v2532_v19 = vpack.c.bf16 %v2131_v63, %v2131_v63  ;;  %v2132_v20 = vmin.f32 %v2100_v49, 6.0  ;;  %v2034_v6 = vmul.f32 %v2773_v55, %v3437_v53  ;;  %v2775_v27 = vadd.f32 %v1909_v2, %v1277_v16  ;;  %v2678_v40 = vpop.f32.mrb[16].mxu1 }
 0x154   : > { %2294 = vst.msk [vmem:[%s3457_s5 + $0x28] sm:$0xf] %vm2283_vm1, %v2534_v11  ;;  %v2535_v32 = vpack.c.bf16 %v2134_v61, %v2134_v61  ;;  %v2073_v7 = vadd.f32 %v3442_v59, %v2036_v13  ;;  %v2037_v36 = vmul.f32 %v2774_v14, %v3437_v53  ;;  %v1290_v46 = vpop.f32.mrb[17].mxu1 }
 0x155   : > { %2292 = vst.msk [vmem:[%s3457_s5 + $0x20] sm:$0xf] %vm2283_vm1, %v2532_v19  ;;  %v2533_v23 = vpack.c.bf16 %v2132_v20, %v2132_v20  ;;  %v2071_v30 = vadd.f32 %v3442_v59, %v2034_v6  ;;  %v2035_v31 = vmul.f32 %v2775_v27, %v3437_v53  ;;  %v2679_v52 = vpop.f32.mrb[18].mxu1 }
 0x156   : > { %2295 = vst.msk [vmem:[%s3457_s5 + $0x2c] sm:$0xf] %vm2283_vm1, %v2535_v32  ;;  %v2105_v45 = vmax.f32 %v2073_v7, 0.0  ;;  %v2074_v50 = vadd.f32 %v3442_v59, %v2037_v36  ;;  %v1293_v34 = vpop.f32.mrb[19].mxu1 }
 0x157   : > { %2293 = vst.msk [vmem:[%s3457_s5 + $0x24] sm:$0xf] %vm2283_vm1, %v2533_v23  ;;  %v2103_v0 = vmax.f32 %v2071_v30, 0.0  ;;  %v2072_v10 = vadd.f32 %v3442_v59, %v2035_v31  ;;  %v2746_v38 = vpop.f32.mrb[16].mxu0 }
 0x158   : > { %v2137_v58 = vmin.f32 %v2105_v45, 6.0  ;;  %v2106_v9 = vmax.f32 %v2074_v50, 0.0  ;;  %v2776_v8 = vadd.f32 %v2746_v38, %v2678_v40  ;;  %v1922_v37 = vpop.f32.mrb[17].mxu0 }
 0x159   : > { %v2135_v39 = vmin.f32 %v2103_v0, 6.0  ;;  %v2104_v47 = vmax.f32 %v2072_v10, 0.0  ;;  %v2777_v24 = vadd.f32 %v1922_v37, %v1290_v46  ;;  %v2747_v1 = vpop.f32.mrb[18].mxu0 }
 0x15a   : > { %v2538_v17 = vpack.c.bf16 %v2137_v58, %v2137_v58  ;;  %v2138_v21 = vmin.f32 %v2106_v9, 6.0  ;;  %v2040_v26 = vmul.f32 %v2776_v8, %v3437_v53  ;;  %v2778_v43 = vadd.f32 %v2747_v1, %v2679_v52  ;;  %v1925_v3 = vpop.f32.mrb[19].mxu0 }
 0x15b   : > { %v2536_v29 = vpack.c.bf16 %v2135_v39, %v2135_v39  ;;  %v2136_v44 = vmin.f32 %v2104_v47, 6.0  ;;  %v2038_v12 = vmul.f32 %v2777_v24, %v3437_v53  ;;  %v2779_v57 = vadd.f32 %v1925_v3, %v1293_v34  ;;  %v2682_v62 = vpop.f32.mrb[20].mxu1 }
 0x15c   : > { %2298 = vst.msk [vmem:[%s3457_s5 + $0x38] sm:$0xf] %vm2283_vm1, %v2538_v17  ;;  %v2539_v48 = vpack.c.bf16 %v2138_v21, %v2138_v21  ;;  %v2077_v41 = vadd.f32 %v3442_v59, %v2040_v26  ;;  %v2041_v42 = vmul.f32 %v2778_v43, %v3437_v53  ;;  %v1306_v15 = vpop.f32.mrb[21].mxu1 }
 0x15d   : > { %2296 = vst.msk [vmem:[%s3457_s5 + $0x30] sm:$0xf] %vm2283_vm1, %v2536_v29  ;;  %v2537_v54 = vpack.c.bf16 %v2136_v44, %v2136_v44  ;;  %v2075_v56 = vadd.f32 %v3442_v59, %v2038_v12  ;;  %v2039_v28 = vmul.f32 %v2779_v57, %v3437_v53  ;;  %v2683_v22 = vpop.f32.mrb[22].mxu1 }
 0x15e   : > { %2299 = vst.msk [vmem:[%s3457_s5 + $0x3c] sm:$0xf] %vm2283_vm1, %v2539_v48  ;;  %v2109_v35 = vmax.f32 %v2077_v41, 0.0  ;;  %v2078_v18 = vadd.f32 %v3442_v59, %v2041_v42  ;;  %v1309_v4 = vpop.f32.mrb[23].mxu1 }
 0x15f   : > { %2297 = vst.msk [vmem:[%s3457_s5 + $0x34] sm:$0xf] %vm2283_vm1, %v2537_v54  ;;  %v2107_v16 = vmax.f32 %v2075_v56, 0.0  ;;  %v2076_v33 = vadd.f32 %v3442_v59, %v2039_v28  ;;  %v2750_v5 = vpop.f32.mrb[20].mxu0 }
 0x160   : > { %v2141_v25 = vmin.f32 %v2109_v35, 6.0  ;;  %v2110_v51 = vmax.f32 %v2078_v18, 0.0  ;;  %v2780_v63 = vadd.f32 %v2750_v5, %v2682_v62  ;;  %v1938_v49 = vpop.f32.mrb[21].mxu0 }
 0x161   : > { %v2139_v55 = vmin.f32 %v2107_v16, 6.0  ;;  %v2108_v60 = vmax.f32 %v2076_v33, 0.0  ;;  %v2781_v11 = vadd.f32 %v1938_v49, %v1306_v15  ;;  %v2751_v61 = vpop.f32.mrb[22].mxu0 }
 0x162   : > { %v2542_v13 = vpack.c.bf16 %v2141_v25, %v2141_v25  ;;  %v2142_v14 = vmin.f32 %v2110_v51, 6.0  ;;  %v2044_v2 = vmul.f32 %v2780_v63, %v3437_v53  ;;  %v2782_v19 = vadd.f32 %v2751_v61, %v2683_v22  ;;  %v1941_v20 = vpop.f32.mrb[23].mxu0 }
 0x163   : > { %v2540_v6 = vpack.c.bf16 %v2139_v55, %v2139_v55  ;;  %v2140_v27 = vmin.f32 %v2108_v60, 6.0  ;;  %v2042_v32 = vmul.f32 %v2781_v11, %v3437_v53  ;;  %v2783_v7 = vadd.f32 %v1941_v20, %v1309_v4  ;;  %v2686_v30 = vpop.f32.mrb[24].mxu1 }
 0x164   : > { %2302 = vst.msk [vmem:[%s3457_s5 + $0x48] sm:$0xf] %vm2283_vm1, %v2542_v13  ;;  %v2543_v36 = vpack.c.bf16 %v2142_v14, %v2142_v14  ;;  %v2081_v40 = vadd.f32 %v3442_v59, %v2044_v2  ;;  %v2045_v23 = vmul.f32 %v2782_v19, %v3437_v53  ;;  %v1322_v50 = vpop.f32.mrb[25].mxu1 }
 0x165   : > { %2300 = vst.msk [vmem:[%s3457_s5 + $0x40] sm:$0xf] %vm2283_vm1, %v2540_v6  ;;  %v2541_v31 = vpack.c.bf16 %v2140_v27, %v2140_v27  ;;  %v2079_v46 = vadd.f32 %v3442_v59, %v2042_v32  ;;  %v2043_v45 = vmul.f32 %v2783_v7, %v3437_v53  ;;  %v2687_v10 = vpop.f32.mrb[26].mxu1 }
 0x166   : > { %2303 = vst.msk [vmem:[%s3457_s5 + $0x4c] sm:$0xf] %vm2283_vm1, %v2543_v36  ;;  %v2113_v52 = vmax.f32 %v2081_v40, 0.0  ;;  %v2082_v0 = vadd.f32 %v3442_v59, %v2045_v23  ;;  %v1325_v58 = vpop.f32.mrb[27].mxu1 }
 0x167   : > { %2301 = vst.msk [vmem:[%s3457_s5 + $0x44] sm:$0xf] %vm2283_vm1, %v2541_v31  ;;  %v2111_v34 = vmax.f32 %v2079_v46, 0.0  ;;  %v2080_v38 = vadd.f32 %v3442_v59, %v2043_v45  ;;  %v2754_v9 = vpop.f32.mrb[24].mxu0 }
 0x168   : > { %v2145_v8 = vmin.f32 %v2113_v52, 6.0  ;;  %v2114_v37 = vmax.f32 %v2082_v0, 0.0  ;;  %v2784_v39 = vadd.f32 %v2754_v9, %v2686_v30  ;;  %v1954_v47 = vpop.f32.mrb[25].mxu0 }
 0x169   : > { %v2143_v24 = vmin.f32 %v2111_v34, 6.0  ;;  %v2112_v1 = vmax.f32 %v2080_v38, 0.0  ;;  %v2785_v17 = vadd.f32 %v1954_v47, %v1322_v50  ;;  %v2755_v21 = vpop.f32.mrb[26].mxu0 }
 0x16a   : > { %v2546_v26 = vpack.c.bf16 %v2145_v8, %v2145_v8  ;;  %v2146_v43 = vmin.f32 %v2114_v37, 6.0  ;;  %v2048_v3 = vmul.f32 %v2784_v39, %v3437_v53  ;;  %v2786_v29 = vadd.f32 %v2755_v21, %v2687_v10  ;;  %v1957_v44 = vpop.f32.mrb[27].mxu0 }
 0x16b   : > { %v2544_v12 = vpack.c.bf16 %v2143_v24, %v2143_v24  ;;  %v2144_v57 = vmin.f32 %v2112_v1, 6.0  ;;  %v2046_v48 = vmul.f32 %v2785_v17, %v3437_v53  ;;  %v2787_v41 = vadd.f32 %v1957_v44, %v1325_v58  ;;  %v2690_v56 = vpop.f32.mrb[28].mxu1 }
 0x16c   : > { %2306 = vst.msk [vmem:[%s3457_s5 + $0x58] sm:$0xf] %vm2283_vm1, %v2546_v26  ;;  %v2547_v42 = vpack.c.bf16 %v2146_v43, %v2146_v43  ;;  %v2085_v62 = vadd.f32 %v3442_v59, %v2048_v3  ;;  %v2049_v54 = vmul.f32 %v2786_v29, %v3437_v53  ;;  %v1338_v18 = vpop.f32.mrb[29].mxu1 }
 0x16d   : > { %2304 = vst.msk [vmem:[%s3457_s5 + $0x50] sm:$0xf] %vm2283_vm1, %v2544_v12  ;;  %v2545_v28 = vpack.c.bf16 %v2144_v57, %v2144_v57  ;;  %v2083_v15 = vadd.f32 %v3442_v59, %v2046_v48  ;;  %v2047_v35 = vmul.f32 %v2787_v41, %v3437_v53  ;;  %v2691_v33 = vpop.f32.mrb[30].mxu1 }
 0x16e   : > { %2307 = vst.msk [vmem:[%s3457_s5 + $0x5c] sm:$0xf] %vm2283_vm1, %v2547_v42  ;;  %v2117_v22 = vmax.f32 %v2085_v62, 0.0  ;;  %v2086_v16 = vadd.f32 %v3442_v59, %v2049_v54  ;;  %v1341_v25 = vpop.f32.mrb[31].mxu1 }
 0x16f   : > { %2305 = vst.msk [vmem:[%s3457_s5 + $0x54] sm:$0xf] %vm2283_vm1, %v2545_v28  ;;  %v2115_v4 = vmax.f32 %v2083_v15, 0.0  ;;  %v2084_v5 = vadd.f32 %v3442_v59, %v2047_v35  ;;  %v2758_v51 = vpop.f32.mrb[28].mxu0 }
 0x170   : > { %v2149_v63 = vmin.f32 %v2117_v22, 6.0  ;;  %v2118_v49 = vmax.f32 %v2086_v16, 0.0  ;;  %v2788_v55 = vadd.f32 %v2758_v51, %v2690_v56  ;;  %v1970_v60 = vpop.f32.mrb[29].mxu0 }
 0x171   : > { %v2147_v11 = vmin.f32 %v2115_v4, 6.0  ;;  %v2116_v61 = vmax.f32 %v2084_v5, 0.0  ;;  %v2789_v13 = vadd.f32 %v1970_v60, %v1338_v18  ;;  %v2759_v14 = vpop.f32.mrb[30].mxu0 }
 0x172   : > { %v2550_v2 = vpack.c.bf16 %v2149_v63, %v2149_v63  ;;  %v2150_v19 = vmin.f32 %v2118_v49, 6.0  ;;  %v2052_v20 = vmul.f32 %v2788_v55, %v3437_v53  ;;  %v2790_v6 = vadd.f32 %v2759_v14, %v2691_v33  ;;  %v1973_v27 = vpop.f32.mrb[31].mxu0 }
 0x173   : > { %v2548_v32 = vpack.c.bf16 %v2147_v11, %v2147_v11  ;;  %v2148_v7 = vmin.f32 %v2116_v61, 6.0  ;;  %v2050_v36 = vmul.f32 %v2789_v13, %v3437_v53  ;;  %v2791_v40 = vadd.f32 %v1973_v27, %v1341_v25 }
 0x174   : > { %2310 = vst.msk [vmem:[%s3457_s5 + $0x68] sm:$0xf] %vm2283_vm1, %v2550_v2  ;;  %v2551_v23 = vpack.c.bf16 %v2150_v19, %v2150_v19  ;;  %v2089_v30 = vadd.f32 %v3442_v59, %v2052_v20  ;;  %v2053_v31 = vmul.f32 %v2790_v6, %v3437_v53 }
 0x175   : > { %2308 = vst.msk [vmem:[%s3457_s5 + $0x60] sm:$0xf] %vm2283_vm1, %v2548_v32  ;;  %v2549_v46 = vpack.c.bf16 %v2148_v7, %v2148_v7  ;;  %v2087_v45 = vadd.f32 %v3442_v59, %v2050_v36  ;;  %v2051_v50 = vmul.f32 %v2791_v40, %v3437_v53 }
 0x176   : > { %2311 = vst.msk [vmem:[%s3457_s5 + $0x6c] sm:$0xf] %vm2283_vm1, %v2551_v23  ;;  %v2121_v52 = vmax.f32 %v2089_v30, 0.0  ;;  %v2090_v0 = vadd.f32 %v3442_v59, %v2053_v31 }
 0x177   : > { %2309 = vst.msk [vmem:[%s3457_s5 + $0x64] sm:$0xf] %vm2283_vm1, %v2549_v46  ;;  %v2119_v10 = vmax.f32 %v2087_v45, 0.0  ;;  %v2088_v34 = vadd.f32 %v3442_v59, %v2051_v50 }
 0x178   : > { %v2153_v38 = vmin.f32 %v2121_v52, 6.0  ;;  %v2122_v58 = vmax.f32 %v2090_v0, 0.0 }
 0x179   : > { %v2151_v9 = vmin.f32 %v2119_v10, 6.0  ;;  %v2120_v8 = vmax.f32 %v2088_v34, 0.0 }
 0x17a   : > { %v2554_v37 = vpack.c.bf16 %v2153_v38, %v2153_v38  ;;  %v2154_v39 = vmin.f32 %v2122_v58, 6.0 }
 0x17b   : > { %v2552_v53 = vpack.c.bf16 %v2151_v9, %v2151_v9  ;;  %v2152_v47 = vmin.f32 %v2120_v8, 6.0 }
 0x17c   : > { %2314 = vst.msk [vmem:[%s3457_s5 + $0x78] sm:$0xf] %vm2283_vm1, %v2554_v37  ;;  %v2555_v24 = vpack.c.bf16 %v2154_v39, %v2154_v39 }
 0x17d   : > { %2312 = vst.msk [vmem:[%s3457_s5 + $0x70] sm:$0xf] %vm2283_vm1, %v2552_v53  ;;  %v2553_v1 = vpack.c.bf16 %v2152_v47, %v2152_v47 }
 0x17e   : > { %2315 = vst.msk [vmem:[%s3457_s5 + $0x7c] sm:$0xf] %vm2283_vm1, %v2555_v24 }
 0x17f   : > { %2313 = vst.msk [vmem:[%s3457_s5 + $0x74] sm:$0xf] %vm2283_vm1, %v2553_v1 }
 0x180 PF: > { %s13_s12 = sadd.s32 1, %s2895_s12  }
 0x181   : > { %p10_p4 = scmp.ge.s32.totalorder %s13_s12, 4  }
 0x183   :  { %12 = sbr.rel (!%p10_p4) target bundleno = 1 (0x1), region = 65 }

</bundles_post_ra>
